<compile_context>
chip_gen: v7x
topology: tpu7x:2x2x1
jax: 0.10.0
libtpu: 0.0.40
codegen_flags: <defaults>
</compile_context>

<pallas_src>
import functools

import jax
import jax.numpy as jnp
from jax.experimental import pallas as pl
from jax.experimental.pallas import tpu as pltpu

H1, H2 = 800, 600            # logical hidden sizes (PyTorch module)
LANE = 128


def _round_up(n, m):
    return ((n + m - 1) // m) * m


H1P = _round_up(H1, LANE)    # 896
H2P = _round_up(H2, LANE)    # 640
OUT_PAD = LANE               # lane-dense output slab width


def qnet_kernel(x_ref, w1_ref, b1_ref, w2_ref, b2_ref, w3_ref, b3_ref, o_ref):
    # fc1 + ReLU in f32: K = state_size is tiny, so the f32 matmul is
    # essentially free and keeps the input-precision-sensitive layer exact.
    h1 = jnp.dot(x_ref[...], w1_ref[...], preferred_element_type=jnp.float32)
    h1 = jnp.maximum(h1 + b1_ref[...], 0.0)
    # fc2 + ReLU: bf16 operands at the MXU, f32 accumulation, f32 VPU work.
    h2 = jnp.dot(h1.astype(jnp.bfloat16), w2_ref[...],
                 preferred_element_type=jnp.float32)
    h2 = jnp.maximum(h2 + b2_ref[...], 0.0)
    # fc3 (no activation), lane-dense padded output slab.
    out = jnp.dot(h2.astype(jnp.bfloat16), w3_ref[...],
                  preferred_element_type=jnp.float32)
    o_ref[...] = (out + b3_ref[...]).astype(o_ref.dtype)


def _pad2(a, rows, cols):
    r, c = a.shape
    return jnp.pad(a, ((0, rows - r), (0, cols - c)))


def pad_and_cast_params(params):
    """Zero-pad to lane-aligned shapes.

    w1 stays f32 (fc1 runs in f32, and it is tiny: state_size x 896); the big
    weights (w2, w3) go to bf16 for the MXU. Biases stay f32 for the VPU path
    (works on v5e which has no bf16 VALUs).
    """
    s = params["w1"].shape[0]
    return {
        "w1": _pad2(params["w1"], s, H1P).astype(jnp.float32),
        "b1": _pad2(params["b1"], 1, H1P).astype(jnp.float32),
        "w2": _pad2(params["w2"], H1P, H2P).astype(jnp.bfloat16),
        "b2": _pad2(params["b2"], 1, H2P).astype(jnp.float32),
        "w3": _pad2(params["w3"], H2P, OUT_PAD).astype(jnp.bfloat16),
        "b3": _pad2(params["b3"], 1, OUT_PAD).astype(jnp.float32),
    }


def _pick_batch_block(B, block_b):
    """Pick (blk, b_pad) to minimize padding while keeping the grid useful.

    - Tiny batches: one grid step (per-step overhead dominates).
    - Medium batches: exactly two grid steps so both v7x TensorCores get work.
    - Large batches: ~block_b rows per step (256 fills the v6e/v7x MXU M dim).
    Block is rounded up to a multiple of 8 sublanes.
    """
    B = max(B, 1)
    if B <= 16:
        n_steps = 1
    elif B <= 2 * block_b:
        n_steps = 2
    else:
        n_steps = pl.cdiv(B, block_b)
    blk = _round_up(pl.cdiv(B, n_steps), 8)
    b_pad = _round_up(B, blk)
    return blk, b_pad


@functools.partial(jax.jit, static_argnames=("action_size", "block_b"))
def qnetwork_forward(x, kparams, *, action_size, block_b=256):
    """x: [B, state_size] float32. kparams: output of pad_and_cast_params."""
    B, S = x.shape
    w1, b1 = kparams["w1"], kparams["b1"]
    w2, b2 = kparams["w2"], kparams["b2"]
    w3, b3 = kparams["w3"], kparams["b3"]

    blk, b_pad = _pick_batch_block(B, block_b)
    if b_pad != B:
        x = jnp.pad(x, ((0, b_pad - B), (0, 0)))
    grid = (b_pad // blk,)

    # Advisory cost hint for XLA's scheduler around this custom call.
    flops = 2 * b_pad * (S * H1P + H1P * H2P + H2P * OUT_PAD)
    bytes_accessed = (x.size * 4 + b_pad * OUT_PAD * 4
                      + w1.size * 4 + (w2.size + w3.size) * 2
                      + (b1.size + b2.size + b3.size) * 4)
    cost = pl.CostEstimate(flops=flops, transcendentals=0,
                           bytes_accessed=bytes_accessed)

    # Weights/biases are grid-invariant: constant index_map + single buffer.
    resident = lambda shape: pl.BlockSpec(shape, lambda i: (0, 0),
                                          pipeline_mode=pl.Buffered(1))

    out_padded = pl.pallas_call(
        qnet_kernel,
        out_shape=jax.ShapeDtypeStruct((b_pad, OUT_PAD), jnp.float32),
        grid_spec=pltpu.PrefetchScalarGridSpec(
            num_scalar_prefetch=0,
            grid=grid,
            in_specs=[
                # streaming x block (double-buffered by default)
                pl.BlockSpec((blk, S), lambda i: (i, 0)),
                # VMEM-resident weights / biases
                resident((S, H1P)),
                resident((1, H1P)),
                resident((H1P, H2P)),
                resident((1, H2P)),
                resident((H2P, OUT_PAD)),
                resident((1, OUT_PAD)),
            ],
            out_specs=pl.BlockSpec((blk, OUT_PAD), lambda i: (i, 0)),
        ),
        compiler_params=pltpu.CompilerParams(
            dimension_semantics=("parallel",),   # megacore split on v7x
        ),
        cost_estimate=cost,
    )(x, w1, b1, w2, b2, w3, b3)

    # Strip batch padding and the lane-dense output padding.
    return out_padded[:B, :action_size]


def init_params(key, state_size, action_size):
    """Deterministic init mirroring nn.Linear's U(-1/sqrt(fan_in), 1/sqrt(fan_in)).

    Weights stored as [in, out] (transpose of PyTorch's [out, in]); biases as
    [1, out]. These are the logical (unpadded, f32) parameters.
    """
    def linear(k, fan_in, fan_out):
        kw, kb = jax.random.split(k)
        bound = 1.0 / jnp.sqrt(fan_in)
        w = jax.random.uniform(kw, (fan_in, fan_out), jnp.float32, -bound, bound)
        b = jax.random.uniform(kb, (1, fan_out), jnp.float32, -bound, bound)
        return w, b

    k1, k2, k3 = jax.random.split(key, 3)
    w1, b1 = linear(k1, state_size, H1)
    w2, b2 = linear(k2, H1, H2)
    w3, b3 = linear(k3, H2, action_size)
    return {"w1": w1, "b1": b1, "w2": w2, "b2": b2, "w3": w3, "b3": b3}


def qnetwork_ref(x, p):
    """Pure-JAX f32 reference for correctness check."""
    h = jnp.maximum(x @ p["w1"] + p["b1"], 0.0)
    h = jnp.maximum(h @ p["w2"] + p["b2"], 0.0)
    return h @ p["w3"] + p["b3"]


if __name__ == "__main__":
    state_size = 8
    action_size = 4

    key = jax.random.PRNGKey(0)
    kx1, kx2, kp = jax.random.split(key, 3)
    params = init_params(kp, state_size, action_size)
    kparams = pad_and_cast_params(params)

    # Small per-step batch (single grid step, blk=8).
    x_small = jax.random.normal(kx1, (8, state_size), jnp.float32)
    out_small = jax.block_until_ready(
        qnetwork_forward(x_small, kparams, action_size=action_size))
    ref_small = qnetwork_ref(x_small, params)
    assert out_small.shape == (8, action_size), out_small.shape
    assert jnp.allclose(out_small, ref_small, atol=3e-2, rtol=3e-2), \
        "mismatch vs reference (small batch)"

    # Training-size batch: exercises the 2-step grid + minimal padding (200 -> 208).
    x_big = jax.random.normal(kx2, (200, state_size), jnp.float32)
    out_big = jax.block_until_ready(
        qnetwork_forward(x_big, kparams, action_size=action_size))
    ref_big = qnetwork_ref(x_big, params)
    assert out_big.shape == (200, action_size), out_big.shape
    assert jnp.allclose(out_big, ref_big, atol=3e-2, rtol=3e-2), \
        "mismatch vs reference (large batch)"

    print("KERNEL_OK")
</pallas_src>

<mosaic_0001>
module attributes {stable_mosaic.version = 11 : i64} {
  func.func @qnet_kernel(%arg0: i32, %arg1: memref<8x8xf32, #tpu.memory_space<vmem>>, %arg2: memref<8x896xf32, #tpu.memory_space<vmem>>, %arg3: memref<1x896xf32, #tpu.memory_space<vmem>>, %arg4: memref<896x640xbf16, #tpu.memory_space<vmem>>, %arg5: memref<1x640xf32, #tpu.memory_space<vmem>>, %arg6: memref<640x128xbf16, #tpu.memory_space<vmem>>, %arg7: memref<1x128xf32, #tpu.memory_space<vmem>>, %arg8: memref<8x128xf32, #tpu.memory_space<vmem>>) attributes {dimension_semantics = [#tpu.dimension_semantics<parallel>], iteration_bounds = array<i64: 1>, scalar_prefetch = 0 : i64, scratch_operands = 0 : i64, tpu.core_type = #tpu.core_type<tc>, window_params = [{transform_indices = @transform_0, window_bounds = array<i64: 8, 8>}, {pipeline_mode = #tpu.pipeline_mode<synchronous>, transform_indices = @transform_1, window_bounds = array<i64: 8, 896>}, {pipeline_mode = #tpu.pipeline_mode<synchronous>, transform_indices = @transform_2, window_bounds = array<i64: 1, 896>}, {pipeline_mode = #tpu.pipeline_mode<synchronous>, transform_indices = @transform_3, window_bounds = array<i64: 896, 640>}, {pipeline_mode = #tpu.pipeline_mode<synchronous>, transform_indices = @transform_4, window_bounds = array<i64: 1, 640>}, {pipeline_mode = #tpu.pipeline_mode<synchronous>, transform_indices = @transform_5, window_bounds = array<i64: 640, 128>}, {pipeline_mode = #tpu.pipeline_mode<synchronous>, transform_indices = @transform_6, window_bounds = array<i64: 1, 128>}, {transform_indices = @transform_7, window_bounds = array<i64: 8, 128>}]} {
    %c0 = arith.constant 0 : index
    %c0_0 = arith.constant 0 : index
    %0 = vector.load %arg1[%c0, %c0_0] : memref<8x8xf32, #tpu.memory_space<vmem>>, vector<8x8xf32>
    %c0_1 = arith.constant 0 : index
    %c0_2 = arith.constant 0 : index
    %1 = vector.load %arg2[%c0_1, %c0_2] : memref<8x896xf32, #tpu.memory_space<vmem>>, vector<8x896xf32>
    %cst = arith.constant dense<0.000000e+00> : vector<8x896xf32>
    %2 = tpu.matmul %0, %1, %cst {dimension_numbers = #tpu.dot_dimension_numbers<[1], [0], [0], [1], [0, 0, 1, 1], [], []>} : vector<8x8xf32>, vector<8x896xf32>, vector<8x896xf32> -> vector<8x896xf32>
    %c0_3 = arith.constant 0 : index
    %c0_4 = arith.constant 0 : index
    %3 = vector.load %arg3[%c0_3, %c0_4] : memref<1x896xf32, #tpu.memory_space<vmem>>, vector<1x896xf32>
    %4 = vector.broadcast %3 : vector<1x896xf32> to vector<8x896xf32>
    %5 = arith.addf %2, %4 : vector<8x896xf32>
    %cst_5 = arith.constant 0.000000e+00 : f32
    %6 = vector.broadcast %cst_5 : f32 to vector<8x896xf32>
    %7 = arith.maximumf %5, %6 : vector<8x896xf32>
    %8 = arith.truncf %7 : vector<8x896xf32> to vector<8x896xbf16>
    %c0_6 = arith.constant 0 : index
    %c0_7 = arith.constant 0 : index
    %9 = vector.load %arg4[%c0_6, %c0_7] : memref<896x640xbf16, #tpu.memory_space<vmem>>, vector<896x640xbf16>
    %cst_8 = arith.constant dense<0.000000e+00> : vector<8x640xf32>
    %10 = tpu.matmul %8, %9, %cst_8 {dimension_numbers = #tpu.dot_dimension_numbers<[1], [0], [0], [1], [0, 0, 1, 1], [], []>} : vector<8x896xbf16>, vector<896x640xbf16>, vector<8x640xf32> -> vector<8x640xf32>
    %c0_9 = arith.constant 0 : index
    %c0_10 = arith.constant 0 : index
    %11 = vector.load %arg5[%c0_9, %c0_10] : memref<1x640xf32, #tpu.memory_space<vmem>>, vector<1x640xf32>
    %12 = vector.broadcast %11 : vector<1x640xf32> to vector<8x640xf32>
    %13 = arith.addf %10, %12 : vector<8x640xf32>
    %cst_11 = arith.constant 0.000000e+00 : f32
    %14 = vector.broadcast %cst_11 : f32 to vector<8x640xf32>
    %15 = arith.maximumf %13, %14 : vector<8x640xf32>
    %16 = arith.truncf %15 : vector<8x640xf32> to vector<8x640xbf16>
    %c0_12 = arith.constant 0 : index
    %c0_13 = arith.constant 0 : index
    %17 = vector.load %arg6[%c0_12, %c0_13] : memref<640x128xbf16, #tpu.memory_space<vmem>>, vector<640x128xbf16>
    %cst_14 = arith.constant dense<0.000000e+00> : vector<8x128xf32>
    %18 = tpu.matmul %16, %17, %cst_14 {dimension_numbers = #tpu.dot_dimension_numbers<[1], [0], [0], [1], [0, 0, 1, 1], [], []>} : vector<8x640xbf16>, vector<640x128xbf16>, vector<8x128xf32> -> vector<8x128xf32>
    %c0_15 = arith.constant 0 : index
    %c0_16 = arith.constant 0 : index
    %19 = vector.load %arg7[%c0_15, %c0_16] : memref<1x128xf32, #tpu.memory_space<vmem>>, vector<1x128xf32>
    %20 = vector.broadcast %19 : vector<1x128xf32> to vector<8x128xf32>
    %21 = arith.addf %18, %20 : vector<8x128xf32>
    %c0_17 = arith.constant 0 : index
    %c0_18 = arith.constant 0 : index
    %22 = vector.load %arg8[%c0_17, %c0_18] : memref<8x128xf32, #tpu.memory_space<vmem>>, vector<8x128xf32>
    tpu.vector_store %arg8[%c0_17, %c0_18], %21 {strides = array<i32>} : memref<8x128xf32, #tpu.memory_space<vmem>>, vector<8x128xf32>,
    return
  }
  func.func @transform_0(%arg0: i32) -> (i32, i32) {
    %c0_i32 = arith.constant 0 : i32
    %c0_i32_0 = arith.constant 0 : i32
    return %arg0, %c0_i32 : i32, i32
  }
  func.func @transform_1(%arg0: i32) -> (i32, i32) {
    %c0_i32 = arith.constant 0 : i32
    %c0_i32_0 = arith.constant 0 : i32
    %c0_i32_1 = arith.constant 0 : i32
    return %c0_i32, %c0_i32_0 : i32, i32
  }
  func.func @transform_2(%arg0: i32) -> (i32, i32) {
    %c0_i32 = arith.constant 0 : i32
    %c0_i32_0 = arith.constant 0 : i32
    %c0_i32_1 = arith.constant 0 : i32
    return %c0_i32, %c0_i32_0 : i32, i32
  }
  func.func @transform_3(%arg0: i32) -> (i32, i32) {
    %c0_i32 = arith.constant 0 : i32
    %c0_i32_0 = arith.constant 0 : i32
    %c0_i32_1 = arith.constant 0 : i32
    return %c0_i32, %c0_i32_0 : i32, i32
  }
  func.func @transform_4(%arg0: i32) -> (i32, i32) {
    %c0_i32 = arith.constant 0 : i32
    %c0_i32_0 = arith.constant 0 : i32
    %c0_i32_1 = arith.constant 0 : i32
    return %c0_i32, %c0_i32_0 : i32, i32
  }
  func.func @transform_5(%arg0: i32) -> (i32, i32) {
    %c0_i32 = arith.constant 0 : i32
    %c0_i32_0 = arith.constant 0 : i32
    %c0_i32_1 = arith.constant 0 : i32
    return %c0_i32, %c0_i32_0 : i32, i32
  }
  func.func @transform_6(%arg0: i32) -> (i32, i32) {
    %c0_i32 = arith.constant 0 : i32
    %c0_i32_0 = arith.constant 0 : i32
    %c0_i32_1 = arith.constant 0 : i32
    return %c0_i32, %c0_i32_0 : i32, i32
  }
  func.func @transform_7(%arg0: i32) -> (i32, i32) {
    %c0_i32 = arith.constant 0 : i32
    %c0_i32_0 = arith.constant 0 : i32
    return %arg0, %c0_i32 : i32, i32
  }
}

</mosaic_0001>

<bundles_post_ra>
// kernel: qnetwork_forward.1
= control target key start
LH: loop header
LB: loop body
LE: loop exit
PB: predicated region body
PF: predicated region fallthrough
CT: control target
= control target key end

     0   :  { %12 = vsyncpa [#allocation3], 0  ;;  %s4630_s0 = inlined_call_operand.hbm [shape: f32[8,8], index: 0, kind: input, shape index: {}]   ;;  %s4631_s1 = inlined_call_operand.hbm [shape: f32[8,896], index: 1, kind: input, shape index: {}]   ;;  %s4632_s2 = inlined_call_operand.hbm [shape: f32[1,896], index: 2, kind: input, shape index: {}]   ;;  %s4633_s3 = inlined_call_operand.hbm [shape: bf16[896,640], index: 3, kind: input, shape index: {}]   ;;  %s4634_s4 = inlined_call_operand.hbm [shape: f32[1,640], index: 4, kind: input, shape index: {}]   ;;  %s4635_s5 = inlined_call_operand.hbm [shape: bf16[640,128], index: 5, kind: input, shape index: {}]   ;;  %s4636_s6 = inlined_call_operand.hbm [shape: f32[1,128], index: 6, kind: input, shape index: {}]   ;;  %s4637_s7 = inlined_call_operand.vmem [shape: f32[8,128], index: 7, kind: output, shape index: {}]  }
   0x1   :  { %13 = vsyncpa [#allocation5], 0 }
   0x2   :  { %14 = vsyncpa [#allocation8], 0 }
   0x3   :  { %15 = vsyncpa [#allocation11], 0  ;;  %s4367_s24 = smov [#allocation4]   ;;  %s4368_s26 = smov [#allocation7]  }
   0x4   :  { %s32_s25 = sshll.u32 %s4367_s24, 4  ;;  %s51_s27 = sshll.u32 %s4368_s26, 4  ;;  %s33_s25 = int_to_ptr.vmem [resolvable:$true] %s32_s25  ;;  %s4421_s27 = int_to_ptr.vmem [resolvable:$true] %s51_s27 }
   0x5   :  { %s4205_s30 = scalar_lea.hbm %s4631_s1, 896 }
   0x6   :  { %p4206_p0 = scmp.ne.s32.totalorder %s4631_s1, %s4205_s30  ;;  %p4209_p1 = scmp.lt.u32.totalorder %s4205_s30, %s4631_s1 }
   0x8   :  { %p4211_p2 = pnand %p4209_p1, %p4206_p0 }
   0xa   :  { %4214 = shalt.err (!%p4211_p2)
}
   0xb   :  { %s4215_s12 = scalar_lea.vmem %s33_s25, 896  ;;  %p4220_p4 = scmp.lt.s32.totalorder %s33_s25, %s33_s25 }
   0xc   :  { %p4216_p3 = scmp.ne.s32.totalorder %s33_s25, %s4215_s12  ;;  %p4221_p5 = scmp.lt.s32.totalorder %s4215_s12, %s4215_s12 }
   0xe   :  { %p4222_p6 = por %p4221_p5, %p4220_p4 }
  0x10   :  { %p4223_p7 = pnand %p4222_p6, %p4216_p3 }
  0x12   :  { %4226 = shalt.err (!%p4223_p7)
}
  0x13   :  { %35 = dma.hbm_to_vmem [thread:$0]  %s4631_s1, 896, %s33_s25, [#allocation5]  }
  0x14   :  { %s4227_s17 = scalar_lea.hbm %s4633_s3, 35840 }
  0x15   :  { %p4228_p8 = scmp.ne.s32.totalorder %s4633_s3, %s4227_s17  ;;  %p4231_p9 = scmp.lt.u32.totalorder %s4227_s17, %s4633_s3 }
  0x17   :  { %p4233_p10 = pnand %p4231_p9, %p4228_p8 }
  0x19   :  { %4236 = shalt.err (!%p4233_p10)
}
  0x1a   :  { %s4237_s22 = scalar_lea.vmem %s4421_s27, 35840  ;;  %p4242_p12 = scmp.lt.s32.totalorder %s4421_s27, %s4421_s27 }
  0x1b   :  { %p4238_p11 = scmp.ne.s32.totalorder %s4421_s27, %s4237_s22  ;;  %p4243_p13 = scmp.lt.s32.totalorder %s4237_s22, %s4237_s22 }
  0x1d   :  { %p4244_p0 = por %p4243_p13, %p4242_p12 }
  0x1f   :  { %p4245_p1 = pnand %p4244_p0, %p4238_p11 }
  0x21   :  { %4248 = shalt.err (!%p4245_p1)
}
  0x22   :  { %s4369_s1 = smov 320   ;;  %s4370_s23 = smov 20  }
  0x23   :  { %57 = dma.hbm_to_vmem [thread:$0]  %s4633_s3, 35840, %s4421_s27, [#allocation8], %s4369_s1, %s4369_s1, %s4370_s23  }
  0x24   :  { %s4371_s26 = smov [#allocation10]   ;;  %s4249_s8 = scalar_lea.hbm %s4635_s5, 5120 }
  0x25   :  { %s73_s28 = sshll.u32 %s4371_s26, 4  ;;  %p4250_p2 = scmp.ne.s32.totalorder %s4635_s5, %s4249_s8  ;;  %s74_s28 = int_to_ptr.vmem [resolvable:$true] %s73_s28 }
  0x26   :  { %p4253_p3 = scmp.lt.u32.totalorder %s4249_s8, %s4635_s5 }
  0x28   :  { %p4255_p4 = pnand %p4253_p3, %p4250_p2 }
  0x2a   :  { %4258 = shalt.err (!%p4255_p4)
}
  0x2b   :  { %s4259_s13 = scalar_lea.vmem %s74_s28, 5120  ;;  %p4264_p6 = scmp.lt.s32.totalorder %s74_s28, %s74_s28 }
  0x2c   :  { %p4260_p5 = scmp.ne.s32.totalorder %s74_s28, %s4259_s13  ;;  %p4265_p7 = scmp.lt.s32.totalorder %s4259_s13, %s4259_s13 }
  0x2e   :  { %p4266_p8 = por %p4265_p7, %p4264_p6 }
  0x30   :  { %p4267_p9 = pnand %p4266_p8, %p4260_p5 }
  0x32   :  { %4270 = shalt.err (!%p4267_p9)
}
  0x33   :  { %s4372_s3 = smov 64   ;;  %s4373_s27 = smov 4  }
  0x34   :  { %79 = dma.hbm_to_vmem [thread:$0]  %s4635_s5, 5120, %s74_s28, [#allocation11], %s4372_s3, %s4372_s3, %s4373_s27  }
  0x35   :  { %s4374_s16 = smov [#allocation2]   ;;  %s4375_s18 = smov [#allocation6]  }
  0x36   :  { %s22_s17 = sshll.u32 %s4374_s16, 4  ;;  %s42_s19 = sshll.u32 %s4375_s18, 4  ;;  %s23_s17 = int_to_ptr.vmem [resolvable:$true] %s22_s17  ;;  %s43_s19 = int_to_ptr.vmem [resolvable:$true] %s42_s19 }
  0x37   :  { %s4271_s22 = scalar_lea.hbm %s4630_s0, 128 }
  0x38   :  { %p4272_p10 = scmp.ne.s32.totalorder %s4630_s0, %s4271_s22  ;;  %p4275_p11 = scmp.lt.u32.totalorder %s4271_s22, %s4630_s0 }
  0x3a   :  { %p4277_p12 = pnand %p4275_p11, %p4272_p10 }
  0x3c   :  { %4280 = shalt.err (!%p4277_p12)
}
  0x3d   :  { %s4281_s5 = scalar_lea.vmem %s23_s17, 128  ;;  %p4286_p0 = scmp.lt.s32.totalorder %s23_s17, %s23_s17 }
  0x3e   :  { %p4282_p13 = scmp.ne.s32.totalorder %s23_s17, %s4281_s5  ;;  %p4287_p1 = scmp.lt.s32.totalorder %s4281_s5, %s4281_s5 }
  0x40   :  { %p4288_p2 = por %p4287_p1, %p4286_p0 }
  0x42   :  { %p4289_p3 = pnand %p4288_p2, %p4282_p13 }
  0x44   :  { %4292 = shalt.err (!%p4289_p3)
}
  0x45   :  { %25 = dma.hbm_to_vmem [thread:$0]  %s4630_s0, 128, %s23_s17, [#allocation3]  }
  0x46   :  { %s4293_s8 = scalar_lea.hbm %s4632_s2, 112 }
  0x47   :  { %p4294_p4 = scmp.ne.s32.totalorder %s4632_s2, %s4293_s8  ;;  %p4297_p5 = scmp.lt.u32.totalorder %s4293_s8, %s4632_s2 }
  0x49   :  { %p4299_p6 = pnand %p4297_p5, %p4294_p4 }
  0x4b   :  { %4302 = shalt.err (!%p4299_p6)
}
  0x4c   :  { %s4303_s13 = scalar_lea.vmem %s43_s19, 112  ;;  %s4307_s3 = scalar_lea.vmem %s43_s19, 128 }
  0x4d   :  { %p4304_p7 = scmp.ne.s32.totalorder %s43_s19, %s4303_s13  ;;  %p4308_p8 = scmp.lt.s32.totalorder %s43_s19, %s43_s19 }
  0x4e   :  { %p4309_p9 = scmp.lt.s32.totalorder %s4307_s3, %s4303_s13 }
  0x50   :  { %p4310_p10 = por %p4309_p9, %p4308_p8 }
  0x52   :  { %p4311_p11 = pnand %p4310_p10, %p4304_p7 }
  0x54   :  { %4314 = shalt.err (!%p4311_p11)
}
  0x55   :  { %45 = dma.hbm_to_vmem [thread:$0]  %s4632_s2, 112, %s43_s19, [#allocation5]  }
  0x56   :  { %s4376_s14 = smov [#allocation9]   ;;  %s4377_s16 = smov [#allocation12]  }
  0x57   :  { %s64_s15 = sshll.u32 %s4376_s14, 4  ;;  %s86_s17 = sshll.u32 %s4377_s16, 4  ;;  %s65_s15 = int_to_ptr.vmem [resolvable:$true] %s64_s15  ;;  %s87_s17 = int_to_ptr.vmem [resolvable:$true] %s86_s17 }
  0x58   :  { %s4315_s21 = scalar_lea.hbm %s4634_s4, 80 }
  0x59   :  { %p4316_p12 = scmp.ne.s32.totalorder %s4634_s4, %s4315_s21  ;;  %p4319_p13 = scmp.lt.u32.totalorder %s4315_s21, %s4634_s4 }
  0x5b   :  { %p4321_p0 = pnand %p4319_p13, %p4316_p12 }
  0x5d   :  { %4324 = shalt.err (!%p4321_p0)
}
  0x5e   :  { %s4325_s2 = scalar_lea.vmem %s65_s15, 80  ;;  %s4329_s19 = scalar_lea.vmem %s65_s15, 96 }
  0x5f   :  { %p4326_p1 = scmp.ne.s32.totalorder %s65_s15, %s4325_s2  ;;  %p4330_p2 = scmp.lt.s32.totalorder %s65_s15, %s65_s15 }
  0x60   :  { %p4331_p3 = scmp.lt.s32.totalorder %s4329_s19, %s4325_s2 }
  0x62   :  { %p4332_p4 = por %p4331_p3, %p4330_p2 }
  0x64   :  { %p4333_p5 = pnand %p4332_p4, %p4326_p1 }
  0x66   :  { %4336 = shalt.err (!%p4333_p5)
}
  0x67   :  { %67 = dma.hbm_to_vmem [thread:$0]  %s4634_s4, 80, %s65_s15, [#allocation8]  }
  0x68   :  { %s4337_s29 = scalar_lea.hbm %s4636_s6, 16 }
  0x69   :  { %p4338_p6 = scmp.ne.s32.totalorder %s4636_s6, %s4337_s29  ;;  %p4341_p7 = scmp.lt.u32.totalorder %s4337_s29, %s4636_s6 }
  0x6b   :  { %p4343_p8 = pnand %p4341_p7, %p4338_p6 }
  0x6d   :  { %4346 = shalt.err (!%p4343_p8)
}
  0x6e   :  { %s4347_s11 = scalar_lea.vmem %s87_s17, 16  ;;  %s4351_s12 = scalar_lea.vmem %s87_s17, 32 }
  0x6f   :  { %p4348_p9 = scmp.ne.s32.totalorder %s87_s17, %s4347_s11  ;;  %p4352_p10 = scmp.lt.s32.totalorder %s87_s17, %s87_s17 }
  0x70   :  { %p4353_p11 = scmp.lt.s32.totalorder %s4351_s12, %s4347_s11 }
  0x72   :  { %p4354_p12 = por %p4353_p11, %p4352_p10 }
  0x74   :  { %p4355_p13 = pnand %p4354_p12, %p4348_p9 }
  0x76   :  { %4358 = shalt.err (!%p4355_p13)
}
  0x77   :  { %89 = dma.hbm_to_vmem [thread:$0]  %s4636_s6, 16, %s87_s17, [#allocation11]  }
  0x78   :  { %4359 = dma.done.wait [#allocation3], 128  }
  0x79   :  { %4360 = vsyncadd [#allocation3], 4294967168 }
  0x7a   :  { %4361 = dma.done.wait [#allocation5], 1008  }
  0x7b   :  { %4362 = vsyncadd [#allocation5], 4294966288 }
  0x7c   :  { %4363 = dma.done.wait [#allocation8], 35920  }
  0x7d   :  { %4364 = vsyncadd [#allocation8], 4294931376 }
  0x7e   :  { %4365 = dma.done.wait [#allocation11], 5136  }
  0x7f   :  { %4366 = vsyncadd [#allocation11], 4294962160  ;;  %v4378_v0 = vmov 0.0   ;;  %v114_v1 = vld [vmem:[#allocation4 + $0x8] sm:$0xff]  ;;  %v113_v2 = vld [vmem:[#allocation4] sm:$0xff]  ;;  %vm157_vm0 = vcmask 64512  }
  0x80   :  { %225 = vmatprep.mubr.f32.mxu1 %v4378_v0  ;;  %v112_v3 = vld [vmem:[#allocation2] sm:$0xff]  ;;  %161 = vmatprep.subr.mxu1 %v114_v1  ;;  %v115_v5 = vld [vmem:[#allocation4 + $0x10] sm:$0xff]  ;;  %v118_v6 = vld [vmem:[#allocation4 + $0x28] sm:$0xff]  ;;  %vm4379_vm1 = vmmov 0  }
  0x81   :  { %v116_v4 = vld [vmem:[#allocation4 + $0x18] sm:$0xff]  ;;  %162 = vmatpush1.msra.mxu1 %v113_v2  ;;  %v117_v8 = vld [vmem:[#allocation4 + $0x20] sm:$0xff]  ;;  %v119_v11 = vld [vmem:[#allocation4 + $0x30] sm:$0xff] }
  0x82   :  { %3231 = vmatmul.mubr.msk.f32.vlgmr.msra.gmra.mrb[0].mxu1 %vm157_vm0, %v112_v3  ;;  %232 = vmatprep.subr.mxu1 %v116_v4  ;;  %v3773_v7 = vld [vmem:[#allocation7 + $0x4] ss:$20 sps:$4 sm:$0xff]   ;;  %v3778_v9 = vld [vmem:[#allocation7] ss:$20 sps:$4 sm:$0xff]   ;;  %v3784_v12 = vld [vmem:[#allocation7 + $0x28] ss:$20 sps:$4 sm:$0xff]  }
  0x83   :  { %233 = vmatpush1.msra.mxu1 %v115_v5  ;;  %296 = vmatprep.mubr.f32.mxu1 %v4378_v0  ;;  %v3779_v10 = vld [vmem:[#allocation7 + $0x2c] ss:$20 sps:$4 sm:$0xff]   ;;  %v3785_v14 = vld [vmem:[#allocation7 + $0x54] ss:$20 sps:$4 sm:$0xff]   ;;  %v3790_v15 = vld [vmem:[#allocation7 + $0x50] ss:$20 sps:$4 sm:$0xff]  }
  0x84   :  { %303 = vmatprep.subr.mxu1 %v118_v6  ;;  %2277 = vmatprep.subr.bf16.mxu0 %v3773_v7  ;;  %v3777_v13 = vld [vmem:[#allocation7 + $0xc] ss:$20 sps:$4 sm:$0xff]   ;;  %v3775_v16 = vld [vmem:[#allocation7 + $0x8] ss:$20 sps:$4 sm:$0xff]   ;;  %v3781_v19 = vld [vmem:[#allocation7 + $0x30] ss:$20 sps:$4 sm:$0xff]  }
  0x85   :  { %2278 = vmatpush1.bf16.msra.mxu0 %v3778_v9  ;;  %v3791_v17 = vld [vmem:[#allocation7 + $0x7c] ss:$20 sps:$4 sm:$0xff]   ;;  %v3783_v18 = vld [vmem:[#allocation7 + $0x34] ss:$20 sps:$4 sm:$0xff]   ;;  %v3796_v20 = vld [vmem:[#allocation7 + $0x78] ss:$20 sps:$4 sm:$0xff]  }
  0x86   :  { %3232 = vmatmul.mubr.msk.f32.vlgmr.msra.gmra.mrb[2].mxu1 %vm157_vm0, %v112_v3  ;;  %2279 = vmatprep.subr.bf16.mxu0 %v3779_v10  ;;  %v3797_v21 = vld [vmem:[#allocation7 + $0xa4] ss:$20 sps:$4 sm:$0xff]   ;;  %v3789_v22 = vld [vmem:[#allocation7 + $0x5c] ss:$20 sps:$4 sm:$0xff]   ;;  %v3802_v23 = vld [vmem:[#allocation7 + $0xa0] ss:$20 sps:$4 sm:$0xff]  }
  0x87   :  { %304 = vmatpush1.msra.mxu1 %v117_v8  ;;  %367 = vmatprep.mubr.f32.mxu1 %v4378_v0  ;;  %v3787_v24 = vld [vmem:[#allocation7 + $0x58] ss:$20 sps:$4 sm:$0xff]   ;;  %v3793_v27 = vld [vmem:[#allocation7 + $0x80] ss:$20 sps:$4 sm:$0xff]   ;;  %v3808_v28 = vld [vmem:[#allocation7 + $0xc8] ss:$20 sps:$4 sm:$0xff]  }
  0x88   :  { %3686 = vmatprep.subr.mxu1 %v4378_v0  ;;  %v3803_v25 = vld [vmem:[#allocation7 + $0xcc] ss:$20 sps:$4 sm:$0xff]   ;;  %v3795_v26 = vld [vmem:[#allocation7 + $0x84] ss:$20 sps:$4 sm:$0xff]   ;;  %v3809_v29 = vld [vmem:[#allocation7 + $0xf4] ss:$20 sps:$4 sm:$0xff]  }
  0x89   :  { %2280 = vmatpush1.bf16.msra.mxu0 %v3784_v12  ;;  %v3801_v30 = vld [vmem:[#allocation7 + $0xac] ss:$20 sps:$4 sm:$0xff]   ;;  %v3814_v31 = vld [vmem:[#allocation7 + $0xf0] ss:$20 sps:$4 sm:$0xff]   ;;  %v3799_v32 = vld [vmem:[#allocation7 + $0xa8] ss:$20 sps:$4 sm:$0xff]   ;;  %v122_v12 = vlaneseq }
  0x8a   :  { %3233 = vmatmul.mubr.msk.f32.vlgmr.msra.gmra.mrb[4].mxu1 %vm157_vm0, %v112_v3  ;;  %2281 = vmatprep.subr.bf16.mxu0 %v3785_v14  ;;  %v3815_v33 = vld [vmem:[#allocation7 + $0x11c] ss:$20 sps:$4 sm:$0xff]   ;;  %v3807_v34 = vld [vmem:[#allocation7 + $0xd4] ss:$20 sps:$4 sm:$0xff]   ;;  %v3820_v36 = vld [vmem:[#allocation7 + $0x118] ss:$20 sps:$4 sm:$0xff]  }
  0x8b   :  { %3687 = vmatpush3.msra.mxu1 %v119_v11  ;;  %3688 = vmatprep.mubr.msk.f32.mxu1 %vm4379_vm1, %v4378_v0  ;;  %v3805_v35 = vld [vmem:[#allocation7 + $0xd0] ss:$20 sps:$4 sm:$0xff]   ;;  %v3826_v39 = vld [vmem:[#allocation7 + $0x140] ss:$20 sps:$4 sm:$0xff]   ;;  %v3811_v40 = vld [vmem:[#allocation7 + $0xf8] ss:$20 sps:$4 sm:$0xff]  }
  0x8c   :  { %2441 = vmatprep.subr.bf16.mxu1 %v3777_v13  ;;  %v3821_v37 = vld [vmem:[#allocation7 + $0x144] ss:$20 sps:$4 sm:$0xff]   ;;  %v3813_v38 = vld [vmem:[#allocation7 + $0xfc] ss:$20 sps:$4 sm:$0xff]   ;;  %v3827_v41 = vld [vmem:[#allocation7 + $0x16c] ss:$20 sps:$4 sm:$0xff]  }
  0x8d   :  { %2282 = vmatpush1.bf16.msra.mxu0 %v3790_v15  ;;  %v3819_v42 = vld [vmem:[#allocation7 + $0x124] ss:$20 sps:$4 sm:$0xff]   ;;  %v3817_v43 = vld [vmem:[#allocation7 + $0x120] ss:$20 sps:$4 sm:$0xff]   ;;  %v3832_v45 = vld [vmem:[#allocation7 + $0x168] ss:$20 sps:$4 sm:$0xff]  }
  0x8e   :  { %3689 = vmatmul.mubr.msk.f32.vlgmr.msra.gmra.mrb[6].mxu1 %vm157_vm0, %v112_v3  ;;  %2283 = vmatprep.subr.bf16.mxu0 %v3791_v17  ;;  %v3825_v44 = vld [vmem:[#allocation7 + $0x14c] ss:$20 sps:$4 sm:$0xff]   ;;  %v3833_v46 = vld [vmem:[#allocation7 + $0x194] ss:$20 sps:$4 sm:$0xff]   ;;  %v3838_v47 = vld [vmem:[#allocation7 + $0x190] ss:$20 sps:$4 sm:$0xff]  }
  0x8f   :  { %2442 = vmatpush1.bf16.msra.mxu1 %v3775_v16  ;;  %v3823_v48 = vld [vmem:[#allocation7 + $0x148] ss:$20 sps:$4 sm:$0xff]   ;;  %v3844_v51 = vld [vmem:[#allocation7 + $0x1b8] ss:$20 sps:$4 sm:$0xff]   ;;  %v3829_v52 = vld [vmem:[#allocation7 + $0x170] ss:$20 sps:$4 sm:$0xff]  }
  0x90   :  { %2443 = vmatprep.subr.bf16.mxu1 %v3783_v18  ;;  %v3839_v49 = vld [vmem:[#allocation7 + $0x1bc] ss:$20 sps:$4 sm:$0xff]   ;;  %v3831_v50 = vld [vmem:[#allocation7 + $0x174] ss:$20 sps:$4 sm:$0xff]   ;;  %v3845_v53 = vld [vmem:[#allocation7 + $0x1e4] ss:$20 sps:$4 sm:$0xff]  }
  0x91   :  { %2284 = vmatpush1.bf16.msra.mxu0 %v3796_v20  ;;  %v3837_v54 = vld [vmem:[#allocation7 + $0x19c] ss:$20 sps:$4 sm:$0xff]   ;;  %v3850_v55 = vld [vmem:[#allocation7 + $0x1e0] ss:$20 sps:$4 sm:$0xff]   ;;  %v3835_v56 = vld [vmem:[#allocation7 + $0x198] ss:$20 sps:$4 sm:$0xff]  }
  0x92   :  { %2285 = vmatprep.subr.bf16.mxu0 %v3797_v21  ;;  %v3851_v57 = vld [vmem:[#allocation7 + $0x20c] ss:$20 sps:$4 sm:$0xff]   ;;  %v3843_v58 = vld [vmem:[#allocation7 + $0x1c4] ss:$20 sps:$4 sm:$0xff]   ;;  %v3856_v59 = vld [vmem:[#allocation7 + $0x208] ss:$20 sps:$4 sm:$0xff]  }
  0x93   :  { %2444 = vmatpush1.bf16.msra.mxu1 %v3781_v19  ;;  %v3841_v60 = vld [vmem:[#allocation7 + $0x1c0] ss:$20 sps:$4 sm:$0xff]   ;;  %v3847_v62 = vld [vmem:[#allocation7 + $0x1e8] ss:$20 sps:$4 sm:$0xff]   ;;  %v3853_v1 = vld [vmem:[#allocation7 + $0x210] ss:$20 sps:$4 sm:$0xff]  }
  0x94   :  { %2445 = vmatprep.subr.bf16.mxu1 %v3789_v22  ;;  %v3849_v61 = vld [vmem:[#allocation7 + $0x1ec] ss:$20 sps:$4 sm:$0xff]   ;;  %v3855_v63 = vld [vmem:[#allocation7 + $0x214] ss:$20 sps:$4 sm:$0xff]   ;;  %v3861_v3 = vld [vmem:[#allocation7 + $0x23c] ss:$20 sps:$4 sm:$0xff]  }
  0x95   :  { %2286 = vmatpush1.bf16.msra.mxu0 %v3802_v23  ;;  %v3857_v2 = vld [vmem:[#allocation7 + $0x234] ss:$20 sps:$4 sm:$0xff]   ;;  %v3859_v4 = vld [vmem:[#allocation7 + $0x238] ss:$20 sps:$4 sm:$0xff]   ;;  %v3862_v5 = vld [vmem:[#allocation7 + $0x230] ss:$20 sps:$4 sm:$0xff]  }
  0x96   :  { %2287 = vmatprep.subr.bf16.mxu0 %v3803_v25  ;;  %v3863_v6 = vld [vmem:[#allocation7 + $0x25c] ss:$20 sps:$4 sm:$0xff]   ;;  %v3867_v7 = vld [vmem:[#allocation7 + $0x264] ss:$20 sps:$4 sm:$0xff]   ;;  %v3865_v8 = vld [vmem:[#allocation7 + $0x260] ss:$20 sps:$4 sm:$0xff]  }
  0x97   :  { %2446 = vmatpush1.bf16.msra.mxu1 %v3787_v24  ;;  %v3868_v9 = vld [vmem:[#allocation7 + $0x258] ss:$20 sps:$4 sm:$0xff]   ;;  %v4522_v13 = vshrl.u32 %v122_v12, 7  ;;  %v3926_v12 = vld [vmem:[#allocation7 + $0x3f0] ss:$20 sps:$4 sm:$0xff]  }
  0x98   :  { %2447 = vmatprep.subr.bf16.mxu1 %v3795_v26  ;;  %v3871_v10 = vld [vmem:[#allocation7 + $0x284] ss:$20 sps:$4 sm:$0xff]   ;;  %v3874_v11 = vld [vmem:[#allocation7 + $0x28c] ss:$20 sps:$4 sm:$0xff]  }
  0x99   :  { %2288 = vmatpush1.bf16.msra.mxu0 %v3808_v28  ;;  %v124_v14 = vsub.s32 0, %v4522_v13  ;;  %v4525_v15 = vld [vmem:[#allocation6] sm:$0xff]  ;;  %v128_v16 = vsub.s32 1, %v4522_v13  ;;  %v136_v19 = vsub.s32 3, %v4522_v13 }
  0x9a   :  { %2289 = vmatprep.subr.bf16.mxu0 %v3809_v29 }
  0x9b   :  { %2448 = vmatpush1.bf16.msra.mxu1 %v3793_v27  ;;  %v125_v17 = vrot.slane %v4525_v15, %v124_v14  ;;  %v129_v18 = vrot.slane %v4525_v15, %v128_v16  ;;  %v137_v24 = vrot.slane %v4525_v15, %v136_v19 }
  0x9c   :  { %2449 = vmatprep.subr.bf16.mxu1 %v3801_v30  ;;  %v3869_v30 = vld [vmem:[#allocation7 + $0x280] ss:$20 sps:$4 sm:$0xff]  }
  0x9d   :  { %2290 = vmatpush1.bf16.msra.mxu0 %v3814_v31  ;;  %v3872_v31 = vld [vmem:[#allocation7 + $0x288] ss:$20 sps:$4 sm:$0xff]  }
  0x9e   :  { %2291 = vmatprep.subr.bf16.mxu0 %v3815_v33 }
  0x9f   :  { %2450 = vmatpush1.bf16.msra.mxu1 %v3799_v32 }
  0xa0   :  { %2451 = vmatprep.subr.bf16.mxu1 %v3807_v34  ;;  %v3877_v34 = vld [vmem:[#allocation7 + $0x2ac] ss:$20 sps:$4 sm:$0xff]  }
  0xa1   :  { %2292 = vmatpush1.bf16.msra.mxu0 %v3820_v36 }
  0xa2   :  { %2293 = vmatprep.subr.bf16.mxu0 %v3821_v37 }
  0xa3   :  { %2452 = vmatpush1.bf16.msra.mxu1 %v3805_v35  ;;  %v3880_v35 = vld [vmem:[#allocation7 + $0x2b4] ss:$20 sps:$4 sm:$0xff]  }
  0xa4   :  { %2453 = vmatprep.subr.bf16.mxu1 %v3813_v38 }
  0xa5   :  { %2294 = vmatpush1.bf16.msra.mxu0 %v3826_v39  ;;  %v3875_v39 = vld [vmem:[#allocation7 + $0x2a8] ss:$20 sps:$4 sm:$0xff]  }
  0xa6   :  { %2295 = vmatprep.subr.bf16.mxu0 %v3827_v41 }
  0xa7   :  { %2454 = vmatpush1.bf16.msra.mxu1 %v3811_v40  ;;  %v3878_v40 = vld [vmem:[#allocation7 + $0x2b0] ss:$20 sps:$4 sm:$0xff]  }
  0xa8   :  { %2455 = vmatprep.subr.bf16.mxu1 %v3819_v42  ;;  %v3883_v42 = vld [vmem:[#allocation7 + $0x2d4] ss:$20 sps:$4 sm:$0xff]  }
  0xa9   :  { %2296 = vmatpush1.bf16.msra.mxu0 %v3832_v45  ;;  %v3884_v45 = vld [vmem:[#allocation7 + $0x2d8] ss:$20 sps:$4 sm:$0xff]  }
  0xaa   :  { %2297 = vmatprep.subr.bf16.mxu0 %v3833_v46  ;;  %v3889_v46 = vld [vmem:[#allocation7 + $0x2fc] ss:$20 sps:$4 sm:$0xff]  }
  0xab   :  { %2456 = vmatpush1.bf16.msra.mxu1 %v3817_v43  ;;  %v3886_v43 = vld [vmem:[#allocation7 + $0x2dc] ss:$20 sps:$4 sm:$0xff]  }
  0xac   :  { %2457 = vmatprep.subr.bf16.mxu1 %v3825_v44  ;;  %v3881_v44 = vld [vmem:[#allocation7 + $0x2d0] ss:$20 sps:$4 sm:$0xff]  }
  0xad   :  { %2298 = vmatpush1.bf16.msra.mxu0 %v3838_v47  ;;  %v3892_v47 = vld [vmem:[#allocation7 + $0x304] ss:$20 sps:$4 sm:$0xff]  }
  0xae   :  { %2299 = vmatprep.subr.bf16.mxu0 %v3839_v49  ;;  %v3890_v49 = vld [vmem:[#allocation7 + $0x300] ss:$20 sps:$4 sm:$0xff]  }
  0xaf   :  { %2458 = vmatpush1.bf16.msra.mxu1 %v3823_v48  ;;  %v3887_v48 = vld [vmem:[#allocation7 + $0x2f8] ss:$20 sps:$4 sm:$0xff]  }
  0xb0   :  { %2459 = vmatprep.subr.bf16.mxu1 %v3831_v50  ;;  %v3895_v50 = vld [vmem:[#allocation7 + $0x324] ss:$20 sps:$4 sm:$0xff]  }
  0xb1   :  { %2300 = vmatpush1.bf16.msra.mxu0 %v3844_v51  ;;  %v3898_v51 = vld [vmem:[#allocation7 + $0x32c] ss:$20 sps:$4 sm:$0xff]  }
  0xb2   :  { %2301 = vmatprep.subr.bf16.mxu0 %v3845_v53  ;;  %v3896_v53 = vld [vmem:[#allocation7 + $0x328] ss:$20 sps:$4 sm:$0xff]  }
  0xb3   :  { %2460 = vmatpush1.bf16.msra.mxu1 %v3829_v52  ;;  %v3893_v52 = vld [vmem:[#allocation7 + $0x320] ss:$20 sps:$4 sm:$0xff]  }
  0xb4   :  { %2461 = vmatprep.subr.bf16.mxu1 %v3837_v54  ;;  %v3901_v54 = vld [vmem:[#allocation7 + $0x34c] ss:$20 sps:$4 sm:$0xff]  }
  0xb5   :  { %2302 = vmatpush1.bf16.msra.mxu0 %v3850_v55  ;;  %v3904_v55 = vld [vmem:[#allocation7 + $0x354] ss:$20 sps:$4 sm:$0xff]  }
  0xb6   :  { %2303 = vmatprep.subr.bf16.mxu0 %v3851_v57  ;;  %v3902_v57 = vld [vmem:[#allocation7 + $0x350] ss:$20 sps:$4 sm:$0xff]  }
  0xb7   :  { %2462 = vmatpush1.bf16.msra.mxu1 %v3835_v56  ;;  %v3899_v56 = vld [vmem:[#allocation7 + $0x348] ss:$20 sps:$4 sm:$0xff]  }
  0xb8   :  { %2463 = vmatprep.subr.bf16.mxu1 %v3843_v58  ;;  %v3907_v58 = vld [vmem:[#allocation7 + $0x374] ss:$20 sps:$4 sm:$0xff]  }
  0xb9   :  { %2304 = vmatpush1.bf16.msra.mxu0 %v3856_v59  ;;  %v3910_v59 = vld [vmem:[#allocation7 + $0x37c] ss:$20 sps:$4 sm:$0xff]  }
  0xba   :  { %2305 = vmatprep.subr.bf16.mxu0 %v3857_v2 }
  0xbb   :  { %2464 = vmatpush1.bf16.msra.mxu1 %v3841_v60  ;;  %v3905_v60 = vld [vmem:[#allocation7 + $0x370] ss:$20 sps:$4 sm:$0xff]  }
  0xbc   :  { %2465 = vmatprep.subr.bf16.mxu1 %v3849_v61  ;;  %v3908_v61 = vld [vmem:[#allocation7 + $0x378] ss:$20 sps:$4 sm:$0xff]  }
  0xbd   :  { %2306 = vmatpush1.bf16.msra.mxu0 %v3862_v5  ;;  %v3919_v5 = vld [vmem:[#allocation7 + $0x3c4] ss:$20 sps:$4 sm:$0xff]  }
  0xbe   :  { %2307 = vmatprep.subr.bf16.mxu0 %v3863_v6  ;;  %v3922_v6 = vld [vmem:[#allocation7 + $0x3cc] ss:$20 sps:$4 sm:$0xff]  }
  0xbf   :  { %2466 = vmatpush1.bf16.msra.mxu1 %v3847_v62 }
  0xc0   :  { %2467 = vmatprep.subr.bf16.mxu1 %v3855_v63  ;;  %v3913_v63 = vld [vmem:[#allocation7 + $0x39c] ss:$20 sps:$4 sm:$0xff]  }
  0xc1   :  { %2308 = vmatpush1.bf16.msra.mxu0 %v3868_v9  ;;  %v3925_v9 = vld [vmem:[#allocation7 + $0x3ec] ss:$20 sps:$4 sm:$0xff]  }
  0xc2   :  { %2318 = vmatprep.subr.bf16.mxu0 %v3871_v10  ;;  %v3928_v10 = vld [vmem:[#allocation7 + $0x3f4] ss:$20 sps:$4 sm:$0xff]  }
  0xc3   :  { %2468 = vmatpush1.bf16.msra.mxu1 %v3853_v1  ;;  %v3916_v1 = vld [vmem:[#allocation7 + $0x3a4] ss:$20 sps:$4 sm:$0xff]  }
  0xc4   :  { %2469 = vmatprep.subr.bf16.mxu1 %v3861_v3  ;;  %v3911_v3 = vld [vmem:[#allocation7 + $0x398] ss:$20 sps:$4 sm:$0xff]  }
  0xc7   :  { %2470 = vmatpush1.bf16.msra.mxu1 %v3859_v4  ;;  %v3914_v4 = vld [vmem:[#allocation7 + $0x3a0] ss:$20 sps:$4 sm:$0xff]  }
  0xc8   :  { %2471 = vmatprep.subr.bf16.mxu1 %v3867_v7  ;;  %v3917_v7 = vld [vmem:[#allocation7 + $0x3c0] ss:$20 sps:$4 sm:$0xff]  }
  0xcb   :  { %2472 = vmatpush1.bf16.msra.mxu1 %v3865_v8  ;;  %v3920_v8 = vld [vmem:[#allocation7 + $0x3c8] ss:$20 sps:$4 sm:$0xff]  }
  0xcc   :  { %2482 = vmatprep.subr.bf16.mxu1 %v3874_v11  ;;  %v3923_v11 = vld [vmem:[#allocation7 + $0x3e8] ss:$20 sps:$4 sm:$0xff]  }
 0x155   :  { %v227_v20 = vpop.f32.mrb[0].mxu1 }
 0x156   :  { %v228_v21 = vadd.f32 %v227_v20, %v125_v17  ;;  %v229_v22 = vpop.f32.mrb[1].mxu1  ;;  %v3931_v17 = vld [vmem:[#allocation7 + $0x414] ss:$20 sps:$4 sm:$0xff]   ;;  %v3929_v20 = vld [vmem:[#allocation7 + $0x410] ss:$20 sps:$4 sm:$0xff]  }
 0x157   :  { %v230_v23 = vadd.f32 %v229_v22, %v129_v18  ;;  %v3934_v18 = vld [vmem:[#allocation7 + $0x41c] ss:$20 sps:$4 sm:$0xff]  }
 0x158   :  { %v444_v25 = vmax.f32 %v228_v21, 0.0  ;;  %v3932_v21 = vld [vmem:[#allocation7 + $0x418] ss:$20 sps:$4 sm:$0xff]   ;;  %v3937_v22 = vld [vmem:[#allocation7 + $0x43c] ss:$20 sps:$4 sm:$0xff]  }
 0x159   :  { %v445_v26 = vmax.f32 %v230_v23, 0.0  ;;  %v4538_v27 = vpop.f32.mrb[2].mxu1  ;;  %v3940_v23 = vld [vmem:[#allocation7 + $0x444] ss:$20 sps:$4 sm:$0xff]  }
 0x15a   :  { %v300_v28 = vpop.f32.mrb[3].mxu1  ;;  %v4542_v33 = vpack.c.bf16 %v444_v25, %v444_v25  ;;  %v3938_v25 = vld [vmem:[#allocation7 + $0x440] ss:$20 sps:$4 sm:$0xff]  }
 0x15b   :  { %v4540_v29 = vpack.c.bf16 %v445_v26, %v445_v26  ;;  %v301_v32 = vadd.f32 %v300_v28, %v137_v24  ;;  %v3935_v24 = vld [vmem:[#allocation7 + $0x438] ss:$20 sps:$4 sm:$0xff]  }
 0x15c   :  { %v3943_v26 = vld [vmem:[#allocation7 + $0x464] ss:$20 sps:$4 sm:$0xff]   ;;  %v3946_v28 = vld [vmem:[#allocation7 + $0x46c] ss:$20 sps:$4 sm:$0xff]  }
 0x15d   :  { %2309 = vmatprep.mubr.bf16.mxu0 %v4540_v29  ;;  %2473 = vmatprep.mubr.bf16.mxu1 %v4540_v29  ;;  %v447_v36 = vmax.f32 %v301_v32, 0.0  ;;  %v4546_v37 = vpop.f32.mrb[4].mxu1  ;;  %v3944_v32 = vld [vmem:[#allocation7 + $0x468] ss:$20 sps:$4 sm:$0xff]  }
 0x15e   :  { %2310 = vmatmul.mubr.bf16.vlgmr.msra.gmra.mrb[0].mxu0 %v4542_v33  ;;  %2474 = vmatmul.mubr.bf16.vlgmr.msra.gmra.mrb[8].mxu1 %v4542_v33  ;;  %v4550_v38 = vpop.f32.mrb[5].mxu1 }
 0x15f   :  { %2319 = vmatpush1.bf16.msra.mxu0 %v3869_v30  ;;  %2483 = vmatpush1.bf16.msra.mxu1 %v3872_v31  ;;  %v4552_v41 = vpack.c.bf16 %v447_v36, %v447_v36  ;;  %v132_v30 = vsub.s32 2, %v4522_v13  ;;  %v3941_v31 = vld [vmem:[#allocation7 + $0x460] ss:$20 sps:$4 sm:$0xff]   ;;  %v144_v36 = vsub.s32 5, %v4522_v13 }
 0x160   :  { %2320 = vmatprep.subr.bf16.mxu0 %v3877_v34  ;;  %2484 = vmatprep.subr.bf16.mxu1 %v3880_v35  ;;  %v3949_v34 = vld [vmem:[#allocation7 + $0x48c] ss:$20 sps:$4 sm:$0xff]   ;;  %v3952_v35 = vld [vmem:[#allocation7 + $0x494] ss:$20 sps:$4 sm:$0xff]  }
 0x161   :  { %2350 = vmatprep.mubr.bf16.mxu0 %v4552_v41  ;;  %2514 = vmatprep.mubr.bf16.mxu1 %v4552_v41  ;;  %v4556_v62 = vpop.f32.mrb[6].mxu1 }
 0x162   :  { %v3690_v2 = vpop.f32.mrb[7].mxu1 }
 0x163   :  { %2321 = vmatpush1.bf16.msra.mxu0 %v3875_v39  ;;  %2485 = vmatpush1.bf16.msra.mxu1 %v3878_v40  ;;  %v133_v39 = vrot.slane %v4525_v15, %v132_v30  ;;  %v3947_v40 = vld [vmem:[#allocation7 + $0x488] ss:$20 sps:$4 sm:$0xff]  }
 0x164   :  { %2322 = vmatprep.subr.bf16.mxu0 %v3883_v42  ;;  %2486 = vmatprep.subr.bf16.mxu1 %v3886_v43  ;;  %v3950_v42 = vld [vmem:[#allocation7 + $0x490] ss:$20 sps:$4 sm:$0xff]   ;;  %v3955_v43 = vld [vmem:[#allocation7 + $0x4b4] ss:$20 sps:$4 sm:$0xff]  }
 0x165   :  { %v3979_v2 = vld [vmem:[#allocation7 + $0x554] ss:$20 sps:$4 sm:$0xff]  }
 0x167   :  { %2323 = vmatpush1.bf16.msra.mxu0 %v3881_v44  ;;  %2487 = vmatpush1.bf16.msra.mxu1 %v3884_v45  ;;  %v3958_v44 = vld [vmem:[#allocation7 + $0x4bc] ss:$20 sps:$4 sm:$0xff]   ;;  %v145_v45 = vrot.slane %v4525_v15, %v144_v36  ;;  %v4018_v36 = vld [vmem:[#allocation7 + $0x64c] ss:$20 sps:$4 sm:$0xff]  }
 0x168   :  { %2324 = vmatprep.subr.bf16.mxu0 %v3889_v46  ;;  %2488 = vmatprep.subr.bf16.mxu1 %v3892_v47  ;;  %v299_v46 = vadd.f32 %v4538_v27, %v133_v39  ;;  %v3953_v47 = vld [vmem:[#allocation7 + $0x4b0] ss:$20 sps:$4 sm:$0xff]   ;;  %v4013_v39 = vld [vmem:[#allocation7 + $0x640] ss:$20 sps:$4 sm:$0xff]  }
 0x16b   :  { %2325 = vmatpush1.bf16.msra.mxu0 %v3887_v48  ;;  %2489 = vmatpush1.bf16.msra.mxu1 %v3890_v49  ;;  %v3956_v48 = vld [vmem:[#allocation7 + $0x4b8] ss:$20 sps:$4 sm:$0xff]   ;;  %v3961_v49 = vld [vmem:[#allocation7 + $0x4dc] ss:$20 sps:$4 sm:$0xff]  }
 0x16c   :  { %2326 = vmatprep.subr.bf16.mxu0 %v3895_v50  ;;  %2490 = vmatprep.subr.bf16.mxu1 %v3898_v51  ;;  %v3964_v50 = vld [vmem:[#allocation7 + $0x4e4] ss:$20 sps:$4 sm:$0xff]   ;;  %v372_v51 = vadd.f32 %v4550_v38, %v145_v45  ;;  %v3976_v38 = vld [vmem:[#allocation7 + $0x534] ss:$20 sps:$4 sm:$0xff]  }
 0x16d   :  { %v4022_v45 = vld [vmem:[#allocation7 + $0x670] ss:$20 sps:$4 sm:$0xff]  }
 0x16e   :  { %v449_v27 = vmax.f32 %v372_v51, 0.0  ;;  %v4036_v51 = vld [vmem:[#allocation7 + $0x6c4] ss:$20 sps:$4 sm:$0xff]  }
 0x16f   :  { %2327 = vmatpush1.bf16.msra.mxu0 %v3893_v52  ;;  %2491 = vmatpush1.bf16.msra.mxu1 %v3896_v53  ;;  %v446_v52 = vmax.f32 %v299_v46, 0.0  ;;  %v3959_v53 = vld [vmem:[#allocation7 + $0x4d8] ss:$20 sps:$4 sm:$0xff]   ;;  %v4027_v46 = vld [vmem:[#allocation7 + $0x694] ss:$20 sps:$4 sm:$0xff]  }
 0x170   :  { %2328 = vmatprep.subr.bf16.mxu0 %v3901_v54  ;;  %2492 = vmatprep.subr.bf16.mxu1 %v3904_v55  ;;  %v3962_v54 = vld [vmem:[#allocation7 + $0x4e0] ss:$20 sps:$4 sm:$0xff]   ;;  %v3967_v55 = vld [vmem:[#allocation7 + $0x504] ss:$20 sps:$4 sm:$0xff]  }
 0x173   :  { %2329 = vmatpush1.bf16.msra.mxu0 %v3899_v56  ;;  %2493 = vmatpush1.bf16.msra.mxu1 %v3902_v57  ;;  %v3970_v56 = vld [vmem:[#allocation7 + $0x50c] ss:$20 sps:$4 sm:$0xff]   ;;  %v4566_v57 = vpack.c.bf16 %v446_v52, %v446_v52 }
 0x174   :  { %2330 = vmatprep.subr.bf16.mxu0 %v3907_v58  ;;  %2494 = vmatprep.subr.bf16.mxu1 %v3910_v59  ;;  %v3965_v58 = vld [vmem:[#allocation7 + $0x500] ss:$20 sps:$4 sm:$0xff]   ;;  %v3968_v59 = vld [vmem:[#allocation7 + $0x508] ss:$20 sps:$4 sm:$0xff]   ;;  %v4031_v52 = vld [vmem:[#allocation7 + $0x6b8] ss:$20 sps:$4 sm:$0xff]  }
 0x177   :  { %2331 = vmatpush1.bf16.msra.mxu0 %v3905_v60  ;;  %2495 = vmatpush1.bf16.msra.mxu1 %v3908_v61  ;;  %v3973_v60 = vld [vmem:[#allocation7 + $0x52c] ss:$20 sps:$4 sm:$0xff]   ;;  %v4568_v61 = vpack.c.bf16 %v449_v27, %v449_v27 }
 0x178   :  { %2332 = vmatprep.subr.bf16.mxu0 %v3913_v63  ;;  %2496 = vmatprep.subr.bf16.mxu1 %v3916_v1  ;;  %v3971_v63 = vld [vmem:[#allocation7 + $0x528] ss:$20 sps:$4 sm:$0xff]   ;;  %v3974_v1 = vld [vmem:[#allocation7 + $0x530] ss:$20 sps:$4 sm:$0xff]   ;;  %v4037_v27 = vld [vmem:[#allocation7 + $0x6e0] ss:$20 sps:$4 sm:$0xff]  }
 0x17b   :  { %2333 = vmatpush1.bf16.msra.mxu0 %v3911_v3  ;;  %2497 = vmatpush1.bf16.msra.mxu1 %v3914_v4  ;;  %v3982_v3 = vld [vmem:[#allocation7 + $0x55c] ss:$20 sps:$4 sm:$0xff]  }
 0x17c   :  { %2334 = vmatprep.subr.bf16.mxu0 %v3919_v5  ;;  %2498 = vmatprep.subr.bf16.mxu1 %v3922_v6  ;;  %v3977_v4 = vld [vmem:[#allocation7 + $0x550] ss:$20 sps:$4 sm:$0xff]   ;;  %v3980_v5 = vld [vmem:[#allocation7 + $0x558] ss:$20 sps:$4 sm:$0xff]  }
 0x17d   :  { %v3985_v6 = vld [vmem:[#allocation7 + $0x57c] ss:$20 sps:$4 sm:$0xff]  }
 0x17f   :  { %2335 = vmatpush1.bf16.msra.mxu0 %v3917_v7  ;;  %2499 = vmatpush1.bf16.msra.mxu1 %v3920_v8  ;;  %v3988_v7 = vld [vmem:[#allocation7 + $0x584] ss:$20 sps:$4 sm:$0xff]  }
 0x180   :  { %2336 = vmatprep.subr.bf16.mxu0 %v3925_v9  ;;  %2500 = vmatprep.subr.bf16.mxu1 %v3928_v10  ;;  %v3983_v8 = vld [vmem:[#allocation7 + $0x578] ss:$20 sps:$4 sm:$0xff]   ;;  %v3986_v9 = vld [vmem:[#allocation7 + $0x580] ss:$20 sps:$4 sm:$0xff]  }
 0x181   :  { %v3991_v10 = vld [vmem:[#allocation7 + $0x5a4] ss:$20 sps:$4 sm:$0xff]  }
 0x183   :  { %2337 = vmatpush1.bf16.msra.mxu0 %v3923_v11  ;;  %2501 = vmatpush1.bf16.msra.mxu1 %v3926_v12  ;;  %v3994_v11 = vld [vmem:[#allocation7 + $0x5ac] ss:$20 sps:$4 sm:$0xff]  }
 0x184   :  { %2338 = vmatprep.subr.bf16.mxu0 %v3931_v17  ;;  %2502 = vmatprep.subr.bf16.mxu1 %v3934_v18  ;;  %v3989_v12 = vld [vmem:[#allocation7 + $0x5a0] ss:$20 sps:$4 sm:$0xff]   ;;  %v3992_v17 = vld [vmem:[#allocation7 + $0x5a8] ss:$20 sps:$4 sm:$0xff]  }
 0x185   :  { %v3997_v18 = vld [vmem:[#allocation7 + $0x5cc] ss:$20 sps:$4 sm:$0xff]  }
 0x187   :  { %2339 = vmatpush1.bf16.msra.mxu0 %v3929_v20  ;;  %2503 = vmatpush1.bf16.msra.mxu1 %v3932_v21  ;;  %v4000_v20 = vld [vmem:[#allocation7 + $0x5d4] ss:$20 sps:$4 sm:$0xff]  }
 0x188   :  { %2340 = vmatprep.subr.bf16.mxu0 %v3937_v22  ;;  %2504 = vmatprep.subr.bf16.mxu1 %v3940_v23  ;;  %v3995_v21 = vld [vmem:[#allocation7 + $0x5c8] ss:$20 sps:$4 sm:$0xff]   ;;  %v3998_v22 = vld [vmem:[#allocation7 + $0x5d0] ss:$20 sps:$4 sm:$0xff]  }
 0x189   :  { %v4003_v23 = vld [vmem:[#allocation7 + $0x5f4] ss:$20 sps:$4 sm:$0xff]  }
 0x18b   :  { %2341 = vmatpush1.bf16.msra.mxu0 %v3935_v24  ;;  %2505 = vmatpush1.bf16.msra.mxu1 %v3938_v25  ;;  %v4006_v24 = vld [vmem:[#allocation7 + $0x5fc] ss:$20 sps:$4 sm:$0xff]  }
 0x18c   :  { %2342 = vmatprep.subr.bf16.mxu0 %v3943_v26  ;;  %2506 = vmatprep.subr.bf16.mxu1 %v3946_v28  ;;  %v4001_v25 = vld [vmem:[#allocation7 + $0x5f0] ss:$20 sps:$4 sm:$0xff]   ;;  %v4004_v26 = vld [vmem:[#allocation7 + $0x5f8] ss:$20 sps:$4 sm:$0xff]  }
 0x18d   :  { %v4009_v28 = vld [vmem:[#allocation7 + $0x61c] ss:$20 sps:$4 sm:$0xff]  }
 0x18f   :  { %2343 = vmatpush1.bf16.msra.mxu0 %v3941_v31  ;;  %2507 = vmatpush1.bf16.msra.mxu1 %v3944_v32  ;;  %v4012_v31 = vld [vmem:[#allocation7 + $0x624] ss:$20 sps:$4 sm:$0xff]  }
 0x190   :  { %2344 = vmatprep.subr.bf16.mxu0 %v3949_v34  ;;  %2508 = vmatprep.subr.bf16.mxu1 %v3952_v35  ;;  %v4007_v32 = vld [vmem:[#allocation7 + $0x618] ss:$20 sps:$4 sm:$0xff]   ;;  %v4010_v34 = vld [vmem:[#allocation7 + $0x620] ss:$20 sps:$4 sm:$0xff]  }
 0x191   :  { %v4015_v35 = vld [vmem:[#allocation7 + $0x644] ss:$20 sps:$4 sm:$0xff]  }
 0x193   :  { %2345 = vmatpush1.bf16.msra.mxu0 %v3947_v40  ;;  %2509 = vmatpush1.bf16.msra.mxu1 %v3950_v42  ;;  %v4016_v40 = vld [vmem:[#allocation7 + $0x648] ss:$20 sps:$4 sm:$0xff]   ;;  %v4021_v42 = vld [vmem:[#allocation7 + $0x66c] ss:$20 sps:$4 sm:$0xff]  }
 0x194   :  { %2346 = vmatprep.subr.bf16.mxu0 %v3955_v43  ;;  %2510 = vmatprep.subr.bf16.mxu1 %v3958_v44  ;;  %v4024_v43 = vld [vmem:[#allocation7 + $0x674] ss:$20 sps:$4 sm:$0xff]  }
 0x195   :  { %v4019_v44 = vld [vmem:[#allocation7 + $0x668] ss:$20 sps:$4 sm:$0xff]  }
 0x197   :  { %2347 = vmatpush1.bf16.msra.mxu0 %v3953_v47  ;;  %2511 = vmatpush1.bf16.msra.mxu1 %v3956_v48  ;;  %v4030_v47 = vld [vmem:[#allocation7 + $0x69c] ss:$20 sps:$4 sm:$0xff]  }
 0x198   :  { %2348 = vmatprep.subr.bf16.mxu0 %v3961_v49  ;;  %2512 = vmatprep.subr.bf16.mxu1 %v3964_v50  ;;  %v4025_v48 = vld [vmem:[#allocation7 + $0x690] ss:$20 sps:$4 sm:$0xff]   ;;  %v4028_v49 = vld [vmem:[#allocation7 + $0x698] ss:$20 sps:$4 sm:$0xff]  }
 0x199   :  { %v4033_v50 = vld [vmem:[#allocation7 + $0x6bc] ss:$20 sps:$4 sm:$0xff]  }
 0x19b   :  { %2349 = vmatpush1.bf16.msra.mxu0 %v3959_v53  ;;  %2513 = vmatpush1.bf16.msra.mxu1 %v3962_v54  ;;  %v4034_v53 = vld [vmem:[#allocation7 + $0x6c0] ss:$20 sps:$4 sm:$0xff]   ;;  %v4039_v54 = vld [vmem:[#allocation7 + $0x6e4] ss:$20 sps:$4 sm:$0xff]  }
 0x19c   :  { %2359 = vmatprep.subr.bf16.mxu0 %v3967_v55  ;;  %2523 = vmatprep.subr.bf16.mxu1 %v3970_v56  ;;  %v4042_v55 = vld [vmem:[#allocation7 + $0x6ec] ss:$20 sps:$4 sm:$0xff]   ;;  %v140_v56 = vsub.s32 4, %v4522_v13 }
 0x19e   :  { %2351 = vmatmul.mubr.bf16.vlgmr.msra.gmra.mrb[0].mxu0 %v4566_v57  ;;  %2515 = vmatmul.mubr.bf16.vlgmr.msra.gmra.mrb[8].mxu1 %v4566_v57 }
 0x19f   :  { %2360 = vmatpush1.bf16.msra.mxu0 %v3965_v58  ;;  %2524 = vmatpush1.bf16.msra.mxu1 %v3968_v59  ;;  %v4040_v58 = vld [vmem:[#allocation7 + $0x6e8] ss:$20 sps:$4 sm:$0xff]   ;;  %v4045_v59 = vld [vmem:[#allocation7 + $0x70c] ss:$20 sps:$4 sm:$0xff]  }
 0x1a0   :  { %2361 = vmatprep.subr.bf16.mxu0 %v3973_v60  ;;  %2525 = vmatprep.subr.bf16.mxu1 %v3976_v38  ;;  %v4048_v60 = vld [vmem:[#allocation7 + $0x714] ss:$20 sps:$4 sm:$0xff]   ;;  %v141_v38 = vrot.slane %v4525_v15, %v140_v56 }
 0x1a1   :  { %2391 = vmatprep.mubr.bf16.mxu0 %v4568_v61  ;;  %2555 = vmatprep.mubr.bf16.mxu1 %v4568_v61 }
 0x1a3   :  { %2362 = vmatpush1.bf16.msra.mxu0 %v3971_v63  ;;  %2526 = vmatpush1.bf16.msra.mxu1 %v3974_v1  ;;  %v4043_v63 = vld [vmem:[#allocation7 + $0x708] ss:$20 sps:$4 sm:$0xff]   ;;  %v4046_v1 = vld [vmem:[#allocation7 + $0x710] ss:$20 sps:$4 sm:$0xff]  }
 0x1a4   :  { %2363 = vmatprep.subr.bf16.mxu0 %v3979_v2  ;;  %2527 = vmatprep.subr.bf16.mxu1 %v3982_v3  ;;  %v4051_v2 = vld [vmem:[#allocation7 + $0x734] ss:$20 sps:$4 sm:$0xff]   ;;  %v4054_v3 = vld [vmem:[#allocation7 + $0x73c] ss:$20 sps:$4 sm:$0xff]  }
 0x1a7   :  { %2364 = vmatpush1.bf16.msra.mxu0 %v3977_v4  ;;  %2528 = vmatpush1.bf16.msra.mxu1 %v3980_v5  ;;  %v370_v4 = vadd.f32 %v4546_v37, %v141_v38  ;;  %v4049_v5 = vld [vmem:[#allocation7 + $0x730] ss:$20 sps:$4 sm:$0xff]   ;;  %v4061_v37 = vld [vmem:[#allocation7 + $0x780] ss:$20 sps:$4 sm:$0xff]  }
 0x1a8   :  { %2365 = vmatprep.subr.bf16.mxu0 %v3985_v6  ;;  %2529 = vmatprep.subr.bf16.mxu1 %v3988_v7  ;;  %v4052_v6 = vld [vmem:[#allocation7 + $0x738] ss:$20 sps:$4 sm:$0xff]   ;;  %v4057_v7 = vld [vmem:[#allocation7 + $0x75c] ss:$20 sps:$4 sm:$0xff]  }
 0x1a9   :  { %v4109_v38 = vld [vmem:[#allocation7 + $0x150] ss:$20 sps:$4 sm:$0xff]  }
 0x1ab   :  { %2366 = vmatpush1.bf16.msra.mxu0 %v3983_v8  ;;  %2530 = vmatpush1.bf16.msra.mxu1 %v3986_v9  ;;  %v4060_v8 = vld [vmem:[#allocation7 + $0x764] ss:$20 sps:$4 sm:$0xff]   ;;  %v448_v9 = vmax.f32 %v370_v4, 0.0 }
 0x1ac   :  { %2367 = vmatprep.subr.bf16.mxu0 %v3991_v10  ;;  %2531 = vmatprep.subr.bf16.mxu1 %v3994_v11  ;;  %v4055_v10 = vld [vmem:[#allocation7 + $0x758] ss:$20 sps:$4 sm:$0xff]   ;;  %v4058_v11 = vld [vmem:[#allocation7 + $0x760] ss:$20 sps:$4 sm:$0xff]  }
 0x1ad   :  { %v4114_v4 = vld [vmem:[#allocation7 + $0x3f8] ss:$20 sps:$4 sm:$0xff]  }
 0x1af   :  { %2368 = vmatpush1.bf16.msra.mxu0 %v3989_v12  ;;  %2532 = vmatpush1.bf16.msra.mxu1 %v3992_v17  ;;  %v4063_v12 = vld [vmem:[#allocation7 + $0x784] ss:$20 sps:$4 sm:$0xff]   ;;  %v4066_v17 = vld [vmem:[#allocation7 + $0x78c] ss:$20 sps:$4 sm:$0xff]  }
 0x1b0   :  { %2369 = vmatprep.subr.bf16.mxu0 %v3997_v18  ;;  %2533 = vmatprep.subr.bf16.mxu1 %v4000_v20  ;;  %v4579_v18 = vpack.c.bf16 %v448_v9, %v448_v9  ;;  %v4064_v20 = vld [vmem:[#allocation7 + $0x788] ss:$20 sps:$4 sm:$0xff]   ;;  %v4119_v9 = vld [vmem:[#allocation7 + $0x60] ss:$20 sps:$4 sm:$0xff]  }
 0x1b3   :  { %2370 = vmatpush1.bf16.msra.mxu0 %v3995_v21  ;;  %2534 = vmatpush1.bf16.msra.mxu1 %v3998_v22  ;;  %v4069_v21 = vld [vmem:[#allocation7 + $0x7ac] ss:$20 sps:$4 sm:$0xff]   ;;  %v4072_v22 = vld [vmem:[#allocation7 + $0x7b4] ss:$20 sps:$4 sm:$0xff]  }
 0x1b4   :  { %2371 = vmatprep.subr.bf16.mxu0 %v4003_v23  ;;  %2535 = vmatprep.subr.bf16.mxu1 %v4006_v24  ;;  %v4067_v23 = vld [vmem:[#allocation7 + $0x7a8] ss:$20 sps:$4 sm:$0xff]   ;;  %v4070_v24 = vld [vmem:[#allocation7 + $0x7b0] ss:$20 sps:$4 sm:$0xff]  }
 0x1b7   :  { %2372 = vmatpush1.bf16.msra.mxu0 %v4001_v25  ;;  %2536 = vmatpush1.bf16.msra.mxu1 %v4004_v26  ;;  %v4075_v25 = vld [vmem:[#allocation7 + $0x7d4] ss:$20 sps:$4 sm:$0xff]   ;;  %v4078_v26 = vld [vmem:[#allocation7 + $0x7dc] ss:$20 sps:$4 sm:$0xff]  }
 0x1b8   :  { %2373 = vmatprep.subr.bf16.mxu0 %v4009_v28  ;;  %2537 = vmatprep.subr.bf16.mxu1 %v4012_v31  ;;  %v4380_v28 = vmov 0   ;;  %v4073_v31 = vld [vmem:[#allocation7 + $0x7d0] ss:$20 sps:$4 sm:$0xff]  }
 0x1bb   :  { %2374 = vmatpush1.bf16.msra.mxu0 %v4007_v32  ;;  %2538 = vmatpush1.bf16.msra.mxu1 %v4010_v34  ;;  %v4076_v32 = vld [vmem:[#allocation7 + $0x7d8] ss:$20 sps:$4 sm:$0xff]   ;;  %v4081_v34 = vld [vmem:[#allocation7 + $0x7fc] ss:$20 sps:$4 sm:$0xff]  }
 0x1bc   :  { %2375 = vmatprep.subr.bf16.mxu0 %v4015_v35  ;;  %2539 = vmatprep.subr.bf16.mxu1 %v4018_v36  ;;  %v4084_v35 = vld [vmem:[#allocation7 + $0x804] ss:$20 sps:$4 sm:$0xff]  }
 0x1bd   :  { %v4079_v36 = vld [vmem:[#allocation7 + $0x7f8] ss:$20 sps:$4 sm:$0xff]  }
 0x1bf   :  { %2376 = vmatpush1.bf16.msra.mxu0 %v4013_v39  ;;  %2540 = vmatpush1.bf16.msra.mxu1 %v4016_v40  ;;  %v4082_v39 = vld [vmem:[#allocation7 + $0x800] ss:$20 sps:$4 sm:$0xff]   ;;  %v4087_v40 = vld [vmem:[#allocation7 + $0x824] ss:$20 sps:$4 sm:$0xff]  }
 0x1c0   :  { %2377 = vmatprep.subr.bf16.mxu0 %v4021_v42  ;;  %2541 = vmatprep.subr.bf16.mxu1 %v4024_v43  ;;  %v4090_v42 = vld [vmem:[#allocation7 + $0x82c] ss:$20 sps:$4 sm:$0xff]   ;;  %v148_v43 = vsub.s32 6, %v4522_v13 }
 0x1c3   :  { %2378 = vmatpush1.bf16.msra.mxu0 %v4019_v44  ;;  %2542 = vmatpush1.bf16.msra.mxu1 %v4022_v45  ;;  %v4085_v44 = vld [vmem:[#allocation7 + $0x820] ss:$20 sps:$4 sm:$0xff]   ;;  %v4088_v45 = vld [vmem:[#allocation7 + $0x828] ss:$20 sps:$4 sm:$0xff]  }
 0x1c4   :  { %2379 = vmatprep.subr.bf16.mxu0 %v4027_v46  ;;  %2543 = vmatprep.subr.bf16.mxu1 %v4030_v47  ;;  %v4093_v46 = vld [vmem:[#allocation7 + $0x84c] ss:$20 sps:$4 sm:$0xff]   ;;  %v4096_v47 = vld [vmem:[#allocation7 + $0x854] ss:$20 sps:$4 sm:$0xff]  }
 0x1c7   :  { %2380 = vmatpush1.bf16.msra.mxu0 %v4025_v48  ;;  %2544 = vmatpush1.bf16.msra.mxu1 %v4028_v49  ;;  %v149_v48 = vrot.slane %v4525_v15, %v148_v43  ;;  %v4091_v49 = vld [vmem:[#allocation7 + $0x848] ss:$20 sps:$4 sm:$0xff]   ;;  %v4103_v15 = vld [vmem:[#allocation7 + $0x898] ss:$20 sps:$4 sm:$0xff]   ;;  %v4143_v43 = vld [vmem:[#allocation7 + $0x790] ss:$20 sps:$4 sm:$0xff]  }
 0x1c8   :  { %2381 = vmatprep.subr.bf16.mxu0 %v4033_v50  ;;  %2545 = vmatprep.subr.bf16.mxu1 %v4036_v51  ;;  %v4094_v50 = vld [vmem:[#allocation7 + $0x850] ss:$20 sps:$4 sm:$0xff]   ;;  %v4099_v51 = vld [vmem:[#allocation7 + $0x874] ss:$20 sps:$4 sm:$0xff]  }
 0x1cb   :  { %2382 = vmatpush1.bf16.msra.mxu0 %v4031_v52  ;;  %2546 = vmatpush1.bf16.msra.mxu1 %v4034_v53  ;;  %v4102_v52 = vld [vmem:[#allocation7 + $0x87c] ss:$20 sps:$4 sm:$0xff]   ;;  %v441_v53 = vadd.f32 %v4556_v62, %v149_v48  ;;  %v4148_v48 = vld [vmem:[#allocation7 + $0x560] ss:$20 sps:$4 sm:$0xff]  }
 0x1cc   :  { %2383 = vmatprep.subr.bf16.mxu0 %v4039_v54  ;;  %2547 = vmatprep.subr.bf16.mxu1 %v4042_v55  ;;  %v4097_v54 = vld [vmem:[#allocation7 + $0x870] ss:$20 sps:$4 sm:$0xff]   ;;  %v4100_v55 = vld [vmem:[#allocation7 + $0x878] ss:$20 sps:$4 sm:$0xff]  }
 0x1cd   :  { %v4111_v62 = vld [vmem:[#allocation7 + $0x10] ss:$20 sps:$4 sm:$0xff]  }
 0x1cf   :  { %2384 = vmatpush1.bf16.msra.mxu0 %v4037_v27  ;;  %2548 = vmatpush1.bf16.msra.mxu1 %v4040_v58  ;;  %v4105_v27 = vld [vmem:[#allocation7 + $0x89c] ss:$20 sps:$4 sm:$0xff]   ;;  %v4108_v58 = vld [vmem:[#allocation7 + $0x8a4] ss:$20 sps:$4 sm:$0xff]  }
 0x1d0   :  { %2385 = vmatprep.subr.bf16.mxu0 %v4045_v59  ;;  %2549 = vmatprep.subr.bf16.mxu1 %v4048_v60  ;;  %v450_v59 = vmax.f32 %v441_v53, 0.0  ;;  %v4106_v60 = vld [vmem:[#allocation7 + $0x8a0] ss:$20 sps:$4 sm:$0xff]   ;;  %v4156_v53 = vld [vmem:[#allocation7 + $0x718] ss:$20 sps:$4 sm:$0xff]  }
 0x1d3   :  { %2386 = vmatpush1.bf16.msra.mxu0 %v4043_v63  ;;  %2550 = vmatpush1.bf16.msra.mxu1 %v4046_v1  ;;  %v4110_v63 = vld [vmem:[#allocation7 + $0x3d0] ss:$20 sps:$4 sm:$0xff]   ;;  %v4586_v1 = vpack.c.bf16 %v450_v59, %v450_v59  ;;  %v4161_v59 = vld [vmem:[#allocation7 + $0x880] ss:$20 sps:$4 sm:$0xff]  }
 0x1d4   :  { %2387 = vmatprep.subr.bf16.mxu0 %v4051_v2  ;;  %2551 = vmatprep.subr.bf16.mxu1 %v4054_v3  ;;  %v4112_v2 = vld [vmem:[#allocation7 + $0x290] ss:$20 sps:$4 sm:$0xff]   ;;  %v4113_v3 = vld [vmem:[#allocation7 + $0x178] ss:$20 sps:$4 sm:$0xff]  }
 0x1d7   :  { %2388 = vmatpush1.bf16.msra.mxu0 %v4049_v5  ;;  %2552 = vmatpush1.bf16.msra.mxu1 %v4052_v6  ;;  %v4115_v5 = vld [vmem:[#allocation7 + $0x38] ss:$20 sps:$4 sm:$0xff]  }
 0x1d8   :  { %2389 = vmatprep.subr.bf16.mxu0 %v4057_v7  ;;  %2553 = vmatprep.subr.bf16.mxu1 %v4060_v8  ;;  %v4116_v6 = vld [vmem:[#allocation7 + $0x2b8] ss:$20 sps:$4 sm:$0xff]   ;;  %v4117_v7 = vld [vmem:[#allocation7 + $0x1a0] ss:$20 sps:$4 sm:$0xff]  }
 0x1d9   :  { %v4118_v8 = vld [vmem:[#allocation7 + $0x420] ss:$20 sps:$4 sm:$0xff]  }
 0x1db   :  { %2390 = vmatpush1.bf16.msra.mxu0 %v4055_v10  ;;  %2554 = vmatpush1.bf16.msra.mxu1 %v4058_v11  ;;  %v4120_v10 = vld [vmem:[#allocation7 + $0x2e0] ss:$20 sps:$4 sm:$0xff]   ;;  %v4121_v11 = vld [vmem:[#allocation7 + $0x1c8] ss:$20 sps:$4 sm:$0xff]  }
 0x1dc   :  { %2400 = vmatprep.subr.bf16.mxu0 %v4063_v12  ;;  %2564 = vmatprep.subr.bf16.mxu1 %v4066_v17  ;;  %v4122_v12 = vld [vmem:[#allocation7 + $0x448] ss:$20 sps:$4 sm:$0xff]  }
 0x1dd   :  { %v4123_v17 = vld [vmem:[#allocation7 + $0x88] ss:$20 sps:$4 sm:$0xff]  }
 0x1de   :  { %2392 = vmatmul.mubr.bf16.vlgmr.msra.gmra.mrb[0].mxu0 %v4579_v18  ;;  %2556 = vmatmul.mubr.bf16.vlgmr.msra.gmra.mrb[8].mxu1 %v4579_v18 }
 0x1df   :  { %2401 = vmatpush1.bf16.msra.mxu0 %v4061_v37  ;;  %2565 = vmatpush1.bf16.msra.mxu1 %v4064_v20  ;;  %v4125_v37 = vld [vmem:[#allocation7 + $0x1f0] ss:$20 sps:$4 sm:$0xff]  }
 0x1e0   :  { %2402 = vmatprep.subr.bf16.mxu0 %v4069_v21  ;;  %2566 = vmatprep.subr.bf16.mxu1 %v4072_v22  ;;  %v4127_v20 = vld [vmem:[#allocation7 + $0xb0] ss:$20 sps:$4 sm:$0xff]   ;;  %v4129_v22 = vld [vmem:[#allocation7 + $0x218] ss:$20 sps:$4 sm:$0xff]  }
 0x1e1   :  { %2432 = vmatprep.mubr.bf16.mxu0 %v4380_v28  ;;  %2596 = vmatprep.mubr.bf16.mxu1 %v4380_v28  ;;  %v4128_v21 = vld [vmem:[#allocation7 + $0x330] ss:$20 sps:$4 sm:$0xff]   ;;  %v4134_v28 = vld [vmem:[#allocation7 + $0x4c0] ss:$20 sps:$4 sm:$0xff]  }
 0x1e3   :  { %2403 = vmatpush1.bf16.msra.mxu0 %v4067_v23  ;;  %2567 = vmatpush1.bf16.msra.mxu1 %v4070_v24  ;;  %v4130_v23 = vld [vmem:[#allocation7 + $0x498] ss:$20 sps:$4 sm:$0xff]  }
 0x1e4   :  { %2404 = vmatprep.subr.bf16.mxu0 %v4075_v25  ;;  %2568 = vmatprep.subr.bf16.mxu1 %v4078_v26  ;;  %v4131_v24 = vld [vmem:[#allocation7 + $0xd8] ss:$20 sps:$4 sm:$0xff]   ;;  %v4133_v26 = vld [vmem:[#allocation7 + $0x240] ss:$20 sps:$4 sm:$0xff]  }
 0x1e5   :  { %v4132_v25 = vld [vmem:[#allocation7 + $0x358] ss:$20 sps:$4 sm:$0xff]  }
 0x1e7   :  { %2405 = vmatpush1.bf16.msra.mxu0 %v4073_v31  ;;  %2569 = vmatpush1.bf16.msra.mxu1 %v4076_v32  ;;  %v4135_v31 = vld [vmem:[#allocation7 + $0x100] ss:$20 sps:$4 sm:$0xff]  }
 0x1e8   :  { %2406 = vmatprep.subr.bf16.mxu0 %v4081_v34  ;;  %2570 = vmatprep.subr.bf16.mxu1 %v4084_v35  ;;  %v4136_v32 = vld [vmem:[#allocation7 + $0x380] ss:$20 sps:$4 sm:$0xff]   ;;  %v4137_v34 = vld [vmem:[#allocation7 + $0x268] ss:$20 sps:$4 sm:$0xff]  }
 0x1e9   :  { %v4138_v35 = vld [vmem:[#allocation7 + $0x4e8] ss:$20 sps:$4 sm:$0xff]  }
 0x1eb   :  { %2407 = vmatpush1.bf16.msra.mxu0 %v4079_v36  ;;  %2571 = vmatpush1.bf16.msra.mxu1 %v4082_v39  ;;  %v4139_v36 = vld [vmem:[#allocation7 + $0x128] ss:$20 sps:$4 sm:$0xff]  }
 0x1ec   :  { %2408 = vmatprep.subr.bf16.mxu0 %v4087_v40  ;;  %2572 = vmatprep.subr.bf16.mxu1 %v4090_v42  ;;  %v4140_v39 = vld [vmem:[#allocation7 + $0x3a8] ss:$20 sps:$4 sm:$0xff]   ;;  %v4141_v40 = vld [vmem:[#allocation7 + $0x650] ss:$20 sps:$4 sm:$0xff]  }
 0x1ed   :  { %v4142_v42 = vld [vmem:[#allocation7 + $0x510] ss:$20 sps:$4 sm:$0xff]  }
 0x1ef   :  { %2409 = vmatpush1.bf16.msra.mxu0 %v4085_v44  ;;  %2573 = vmatpush1.bf16.msra.mxu1 %v4088_v45  ;;  %v4144_v44 = vld [vmem:[#allocation7 + $0x678] ss:$20 sps:$4 sm:$0xff]  }
 0x1f0   :  { %2410 = vmatprep.subr.bf16.mxu0 %v4093_v46  ;;  %2574 = vmatprep.subr.bf16.mxu1 %v4096_v47  ;;  %v4145_v45 = vld [vmem:[#allocation7 + $0x538] ss:$20 sps:$4 sm:$0xff]   ;;  %v4147_v47 = vld [vmem:[#allocation7 + $0x6a0] ss:$20 sps:$4 sm:$0xff]  }
 0x1f1   :  { %v4146_v46 = vld [vmem:[#allocation7 + $0x7b8] ss:$20 sps:$4 sm:$0xff]  }
 0x1f3   :  { %2411 = vmatpush1.bf16.msra.mxu0 %v4091_v49  ;;  %2575 = vmatpush1.bf16.msra.mxu1 %v4094_v50  ;;  %v4150_v49 = vld [vmem:[#allocation7 + $0x6c8] ss:$20 sps:$4 sm:$0xff]   ;;  %v4153_v50 = vld [vmem:[#allocation7 + $0x6f0] ss:$20 sps:$4 sm:$0xff]  }
 0x1f4   :  { %2412 = vmatprep.subr.bf16.mxu0 %v4099_v51  ;;  %2576 = vmatprep.subr.bf16.mxu1 %v4102_v52  ;;  %v4154_v51 = vld [vmem:[#allocation7 + $0x5b0] ss:$20 sps:$4 sm:$0xff]  }
 0x1f5   :  { %v4155_v52 = vld [vmem:[#allocation7 + $0x830] ss:$20 sps:$4 sm:$0xff]  }
 0x1f7   :  { %2413 = vmatpush1.bf16.msra.mxu0 %v4097_v54  ;;  %2577 = vmatpush1.bf16.msra.mxu1 %v4100_v55  ;;  %v4157_v54 = vld [vmem:[#allocation7 + $0x5d8] ss:$20 sps:$4 sm:$0xff]  }
 0x1f8   :  { %2414 = vmatprep.subr.bf16.mxu0 %v4105_v27  ;;  %2578 = vmatprep.subr.bf16.mxu1 %v4108_v58  ;;  %v4158_v55 = vld [vmem:[#allocation7 + $0x858] ss:$20 sps:$4 sm:$0xff]   ;;  %v4159_v27 = vld [vmem:[#allocation7 + $0x740] ss:$20 sps:$4 sm:$0xff]  }
 0x1f9   :  { %v4160_v58 = vld [vmem:[#allocation7 + $0x600] ss:$20 sps:$4 sm:$0xff]  }
 0x1fb   :  { %2415 = vmatpush1.bf16.msra.mxu0 %v4103_v15  ;;  %2579 = vmatpush1.bf16.msra.mxu1 %v4106_v60  ;;  %v4162_v15 = vld [vmem:[#allocation7 + $0x768] ss:$20 sps:$4 sm:$0xff]  }
 0x1fc   :  { %3558 = vmatprep.subr.bf16.mxu0 %v4109_v38  ;;  %3580 = vmatprep.subr.bf16.mxu1 %v4110_v63  ;;  %v4163_v60 = vld [vmem:[#allocation7 + $0x628] ss:$20 sps:$4 sm:$0xff]  }
 0x1fd   :  { %v4164_v38 = vld [vmem:[#allocation7 + $0x8a8] ss:$20 sps:$4 sm:$0xff]  }
 0x1fe   :  { %2433 = vmatmul.mubr.bf16.vlgmr.msra.gmra.mrb[0].mxu0 %v4586_v1  ;;  %2597 = vmatmul.mubr.bf16.vlgmr.msra.gmra.mrb[8].mxu1 %v4586_v1  ;;  %v4165_v63 = vld [vmem:[#allocation10 + $0x40] sm:$0xff]  }
 0x1ff   :  { %3559 = vmatpush3.bf16.msra.mxu0 %v4111_v62  ;;  %2637 = vmatprep.mubr.bf16.mxu0 %v4540_v29  ;;  %v4124_v29 = vld [vmem:[#allocation7 + $0x308] ss:$20 sps:$4 sm:$0xff]  }
 0x200   :  { %3581 = vmatpush3.bf16.msra.mxu1 %v4112_v2  ;;  %2677 = vmatprep.mubr.bf16.mxu1 %v4552_v41  ;;  %v4126_v41 = vld [vmem:[#allocation7 + $0x470] ss:$20 sps:$4 sm:$0xff]  }
 0x201   :  { %3560 = vmatprep.subr.bf16.mxu0 %v4113_v3  ;;  %3582 = vmatprep.subr.bf16.mxu1 %v4114_v4  ;;  %v4166_v62 = vld [vmem:[#allocation10 + $0xc0] sm:$0xff]   ;;  %v4169_v4 = vld [vmem:[#allocation10 + $0x48] sm:$0xff]  }
 0x202   :  { %v4167_v2 = vld [vmem:[#allocation10] sm:$0xff]  }
 0x203   :  { %3561 = vmatpush3.bf16.msra.mxu0 %v4115_v5  ;;  %v4168_v3 = vld [vmem:[#allocation10 + $0x80] sm:$0xff]   ;;  %v4170_v5 = vld [vmem:[#allocation10 + $0xc8] sm:$0xff]  }
 0x204   :  { %3583 = vmatpush3.bf16.msra.mxu1 %v4116_v6  ;;  %3562 = vmatprep.subr.bf16.mxu0 %v4117_v7  ;;  %v4171_v6 = vld [vmem:[#allocation10 + $0x8] sm:$0xff]  }
 0x205   :  { %3584 = vmatprep.subr.bf16.mxu1 %v4118_v8  ;;  %v4172_v7 = vld [vmem:[#allocation10 + $0x88] sm:$0xff]   ;;  %v4173_v8 = vld [vmem:[#allocation10 + $0x50] sm:$0xff]  }
 0x207   :  { %3563 = vmatpush3.bf16.msra.mxu0 %v4119_v9  ;;  %v4174_v9 = vld [vmem:[#allocation10 + $0xd0] sm:$0xff]  }
 0x208   :  { %3585 = vmatpush3.bf16.msra.mxu1 %v4120_v10  ;;  %3564 = vmatprep.subr.bf16.mxu0 %v4121_v11  ;;  %v4175_v10 = vld [vmem:[#allocation10 + $0x10] sm:$0xff]  }
 0x209   :  { %3586 = vmatprep.subr.bf16.mxu1 %v4122_v12  ;;  %v4176_v11 = vld [vmem:[#allocation10 + $0x90] sm:$0xff]   ;;  %v4177_v12 = vld [vmem:[#allocation10 + $0x58] sm:$0xff]  }
 0x20b   :  { %3565 = vmatpush3.bf16.msra.mxu0 %v4123_v17  ;;  %v4178_v17 = vld [vmem:[#allocation10 + $0xd8] sm:$0xff]  }
 0x20c   :  { %3587 = vmatpush3.bf16.msra.mxu1 %v4124_v29  ;;  %3566 = vmatprep.subr.bf16.mxu0 %v4125_v37  ;;  %v4181_v29 = vld [vmem:[#allocation10 + $0x60] sm:$0xff]  }
 0x20d   :  { %3588 = vmatprep.subr.bf16.mxu1 %v4126_v41  ;;  %v4182_v37 = vld [vmem:[#allocation10 + $0xe0] sm:$0xff]  }
 0x20e   :  { %v4183_v41 = vld [vmem:[#allocation10 + $0x20] sm:$0xff]  }
 0x20f   :  { %3567 = vmatpush3.bf16.msra.mxu0 %v4127_v20  ;;  %v4184_v20 = vld [vmem:[#allocation10 + $0xa0] sm:$0xff]  }
 0x210   :  { %3589 = vmatpush3.bf16.msra.mxu1 %v4128_v21  ;;  %3568 = vmatprep.subr.bf16.mxu0 %v4129_v22  ;;  %v4185_v21 = vld [vmem:[#allocation10 + $0x68] sm:$0xff]  }
 0x211   :  { %3590 = vmatprep.subr.bf16.mxu1 %v4130_v23  ;;  %v4186_v22 = vld [vmem:[#allocation10 + $0xe8] sm:$0xff]  }
 0x212   :  { %v4187_v23 = vld [vmem:[#allocation10 + $0x28] sm:$0xff]  }
 0x213   :  { %3569 = vmatpush3.bf16.msra.mxu0 %v4131_v24  ;;  %v4188_v24 = vld [vmem:[#allocation10 + $0xa8] sm:$0xff]  }
 0x214   :  { %3591 = vmatpush3.bf16.msra.mxu1 %v4132_v25  ;;  %3570 = vmatprep.subr.bf16.mxu0 %v4133_v26  ;;  %v4189_v25 = vld [vmem:[#allocation10 + $0x70] sm:$0xff]  }
 0x215   :  { %3592 = vmatprep.subr.bf16.mxu1 %v4134_v28  ;;  %v4190_v26 = vld [vmem:[#allocation10 + $0xf0] sm:$0xff]  }
 0x216   :  { %v4191_v28 = vld [vmem:[#allocation10 + $0x30] sm:$0xff]  }
 0x217   :  { %3571 = vmatpush3.bf16.msra.mxu0 %v4135_v31  ;;  %v4192_v31 = vld [vmem:[#allocation10 + $0xb0] sm:$0xff]  }
 0x218   :  { %3593 = vmatpush3.bf16.msra.mxu1 %v4136_v32  ;;  %3572 = vmatprep.subr.bf16.mxu0 %v4137_v34  ;;  %v4193_v32 = vld [vmem:[#allocation10 + $0x78] sm:$0xff]  }
 0x219   :  { %3594 = vmatprep.subr.bf16.mxu1 %v4138_v35  ;;  %v4194_v34 = vld [vmem:[#allocation10 + $0xf8] sm:$0xff]  }
 0x21a   :  { %v4195_v35 = vld [vmem:[#allocation10 + $0x38] sm:$0xff]  }
 0x21b   :  { %3573 = vmatpush3.bf16.msra.mxu0 %v4139_v36  ;;  %v4196_v36 = vld [vmem:[#allocation10 + $0xb8] sm:$0xff]  }
 0x21c   :  { %3595 = vmatpush3.bf16.msra.mxu1 %v4140_v39  ;;  %3602 = vmatprep.subr.bf16.mxu0 %v4141_v40  ;;  %v794_v39 = vld [vmem:[#allocation9] sm:$0x1f] }
 0x21d   :  { %3691 = vmatprep.subr.bf16.mxu1 %v4378_v0  ;;  %v799_v40 = vrot.slane %v794_v39, %v124_v14 }
 0x21e   :  { %2638 = vmatmul.mubr.bf16.vlgmr.msra.gmra.mrb[4].mxu0 %v4542_v33  ;;  %v4149_v33 = vld [vmem:[#allocation7 + $0x7e0] ss:$20 sps:$4 sm:$0xff]  }
 0x21f   :  { %2678 = vmatmul.mubr.bf16.vlgmr.msra.gmra.mrb[12].mxu1 %v4566_v57  ;;  %3603 = vmatpush3.bf16.msra.mxu0 %v4142_v42  ;;  %v4151_v57 = vld [vmem:[#allocation7 + $0x588] ss:$20 sps:$4 sm:$0xff]   ;;  %v807_v42 = vrot.slane %v794_v39, %v132_v30 }
 0x220   :  { %2717 = vmatprep.mubr.bf16.mxu0 %v4568_v61  ;;  %3692 = vmatpush3.bf16.msra.mxu1 %v4143_v43  ;;  %v4152_v61 = vld [vmem:[#allocation7 + $0x808] ss:$20 sps:$4 sm:$0xff]   ;;  %v803_v43 = vrot.slane %v794_v39, %v128_v16 }
 0x221   :  { %3604 = vmatprep.subr.bf16.mxu0 %v4144_v44  ;;  %3693 = vmatprep.subr.bf16.mxu1 %v4378_v0  ;;  %v811_v44 = vrot.slane %v794_v39, %v136_v19 }
 0x222   :  { %3707 = vmatprep.mubr.msk.bf16.mxu1 %vm4379_vm1, %v4378_v0 }
 0x223   :  { %3605 = vmatpush3.bf16.msra.mxu0 %v4145_v45 }
 0x224   :  { %3694 = vmatpush3.bf16.msra.mxu1 %v4146_v46  ;;  %3606 = vmatprep.subr.bf16.mxu0 %v4147_v47 }
 0x225   :  { %3695 = vmatprep.subr.bf16.mxu1 %v4378_v0 }
 0x227   :  { %3607 = vmatpush3.bf16.msra.mxu0 %v4148_v48 }
 0x228   :  { %3696 = vmatpush3.bf16.msra.mxu1 %v4149_v33  ;;  %3608 = vmatprep.subr.bf16.mxu0 %v4150_v49 }
 0x229   :  { %3697 = vmatprep.subr.bf16.mxu1 %v4378_v0 }
 0x22b   :  { %3609 = vmatpush3.bf16.msra.mxu0 %v4151_v57 }
 0x22c   :  { %3698 = vmatpush3.bf16.msra.mxu1 %v4152_v61  ;;  %3610 = vmatprep.subr.bf16.mxu0 %v4153_v50 }
 0x22d   :  { %3699 = vmatprep.subr.bf16.mxu1 %v4378_v0 }
 0x22f   :  { %3611 = vmatpush3.bf16.msra.mxu0 %v4154_v51 }
 0x230   :  { %3700 = vmatpush3.bf16.msra.mxu1 %v4155_v52  ;;  %3612 = vmatprep.subr.bf16.mxu0 %v4156_v53 }
 0x231   :  { %3701 = vmatprep.subr.bf16.mxu1 %v4378_v0 }
 0x233   :  { %3613 = vmatpush3.bf16.msra.mxu0 %v4157_v54 }
 0x234   :  { %3702 = vmatpush3.bf16.msra.mxu1 %v4158_v55  ;;  %3614 = vmatprep.subr.bf16.mxu0 %v4159_v27 }
 0x235   :  { %3703 = vmatprep.subr.bf16.mxu1 %v4378_v0 }
 0x237   :  { %3615 = vmatpush3.bf16.msra.mxu0 %v4160_v58  ;;  %v4197_v58 = vld [vmem:[#allocation10 + $0x100] sm:$0xff]  }
 0x238   :  { %3704 = vmatpush3.bf16.msra.mxu1 %v4161_v59  ;;  %3616 = vmatprep.subr.bf16.mxu0 %v4162_v15  ;;  %v4198_v15 = vld [vmem:[#allocation10 + $0x108] sm:$0xff]  }
 0x239   :  { %3705 = vmatprep.subr.bf16.mxu1 %v4378_v0 }
 0x23b   :  { %3617 = vmatpush3.bf16.msra.mxu0 %v4163_v60  ;;  %v4199_v60 = vld [vmem:[#allocation10 + $0x110] sm:$0xff]  }
 0x23c   :  { %3706 = vmatpush3.bf16.msra.mxu1 %v4164_v38  ;;  %3633 = vmatprep.subr.bf16.mxu0 %v4165_v63  ;;  %v4200_v38 = vld [vmem:[#allocation10 + $0x118] sm:$0xff]   ;;  %v4201_v63 = vld [vmem:[#allocation10 + $0x120] sm:$0xff]  }
 0x23d   :  { %3655 = vmatprep.subr.bf16.mxu1 %v4166_v62  ;;  %v4202_v62 = vld [vmem:[#allocation10 + $0x128] sm:$0xff]  }
 0x23e   :  { %2718 = vmatmul.mubr.bf16.vlgmr.msra.gmra.mrb[8].mxu0 %v4579_v18  ;;  %v4179_v18 = vld [vmem:[#allocation10 + $0x18] sm:$0xff]  }
 0x23f   :  { %3708 = vmatmul.mubr.bf16.vlgmr.msra.gmra.mrb[16].mxu1 %v4586_v1  ;;  %3634 = vmatpush3.bf16.msra.mxu0 %v4167_v2  ;;  %v4180_v1 = vld [vmem:[#allocation10 + $0x98] sm:$0xff]   ;;  %v4203_v2 = vld [vmem:[#allocation10 + $0x130] sm:$0xff]  }
 0x240   :  { %3656 = vmatpush3.bf16.msra.mxu1 %v4168_v3  ;;  %3635 = vmatprep.subr.bf16.mxu0 %v4169_v4  ;;  %v815_v4 = vrot.slane %v794_v39, %v140_v56 }
 0x241   :  { %3657 = vmatprep.subr.bf16.mxu1 %v4170_v5 }
 0x243   :  { %3636 = vmatpush3.bf16.msra.mxu0 %v4171_v6 }
 0x244   :  { %3658 = vmatpush3.bf16.msra.mxu1 %v4172_v7  ;;  %3637 = vmatprep.subr.bf16.mxu0 %v4173_v8 }
 0x245   :  { %3659 = vmatprep.subr.bf16.mxu1 %v4174_v9 }
 0x247   :  { %3638 = vmatpush3.bf16.msra.mxu0 %v4175_v10  ;;  %v4204_v10 = vld [vmem:[#allocation10 + $0x138] sm:$0xff]  }
 0x248   :  { %3660 = vmatpush3.bf16.msra.mxu1 %v4176_v11  ;;  %3639 = vmatprep.subr.bf16.mxu0 %v4177_v12 }
 0x249   :  { %3661 = vmatprep.subr.bf16.mxu1 %v4178_v17 }
 0x24b   :  { %3640 = vmatpush3.bf16.msra.mxu0 %v4179_v18 }
 0x24c   :  { %3662 = vmatpush3.bf16.msra.mxu1 %v4180_v1  ;;  %3641 = vmatprep.subr.bf16.mxu0 %v4181_v29 }
 0x24d   :  { %3663 = vmatprep.subr.bf16.mxu1 %v4182_v37 }
 0x24f   :  { %3642 = vmatpush3.bf16.msra.mxu0 %v4183_v41 }
 0x250   :  { %3664 = vmatpush3.bf16.msra.mxu1 %v4184_v20  ;;  %3643 = vmatprep.subr.bf16.mxu0 %v4185_v21 }
 0x251   :  { %3665 = vmatprep.subr.bf16.mxu1 %v4186_v22 }
 0x253   :  { %3644 = vmatpush3.bf16.msra.mxu0 %v4187_v23 }
 0x254   :  { %3666 = vmatpush3.bf16.msra.mxu1 %v4188_v24  ;;  %3645 = vmatprep.subr.bf16.mxu0 %v4189_v25 }
 0x255   :  { %3667 = vmatprep.subr.bf16.mxu1 %v4190_v26 }
 0x257   :  { %3646 = vmatpush3.bf16.msra.mxu0 %v4191_v28 }
 0x258   :  { %3668 = vmatpush3.bf16.msra.mxu1 %v4192_v31  ;;  %3647 = vmatprep.subr.bf16.mxu0 %v4193_v32 }
 0x259   :  { %3669 = vmatprep.subr.bf16.mxu1 %v4194_v34  ;;  %v3515_v34 = vld [vmem:[#allocation12] ss:$0 sm:$0xff] }
 0x25b   :  { %3648 = vmatpush3.bf16.msra.mxu0 %v4195_v35 }
 0x25c   :  { %3670 = vmatpush3.bf16.msra.mxu1 %v4196_v36  ;;  %3711 = vmatprep.subr.bf16.mxu0 %v4378_v0 }
 0x2d1   :  { %v2434_v45 = vpop.f32.mrb[0].mxu0  ;;  %v2598_v46 = vpop.f32.mrb[8].mxu1 }
 0x2d2   :  { %v3731_v47 = vadd.f32 %v2434_v45, %v799_v40  ;;  %v3733_v48 = vadd.f32 %v2598_v46, %v807_v42  ;;  %v2436_v33 = vpop.f32.mrb[1].mxu0  ;;  %v2600_v49 = vpop.f32.mrb[9].mxu1 }
 0x2d3   :  { %v3732_v57 = vadd.f32 %v2436_v33, %v803_v43  ;;  %v3734_v61 = vadd.f32 %v2600_v49, %v811_v44  ;;  %v2438_v50 = vpop.f32.mrb[2].mxu0  ;;  %v2602_v51 = vpop.f32.mrb[10].mxu1 }
 0x2d4   :  { %v2765_v14 = vmax.f32 %v3731_v47, 0.0  ;;  %v2767_v52 = vmax.f32 %v3733_v48, 0.0  ;;  %v2439_v53 = vpop.f32.mrb[3].mxu0  ;;  %v2603_v30 = vpop.f32.mrb[11].mxu1 }
 0x2d5   :  { %v2766_v54 = vmax.f32 %v3732_v57, 0.0  ;;  %v2768_v55 = vmax.f32 %v3734_v61, 0.0 }
 0x2d6   :  { %v2770_v19 = vpack.c.bf16 %v2765_v14, %v2765_v14  ;;  %v2772_v59 = vpack.c.bf16 %v2767_v52, %v2767_v52 }
 0x2d7   :  { %v2771_v16 = vpack.c.bf16 %v2766_v54, %v2766_v54  ;;  %v2773_v27 = vpack.c.bf16 %v2768_v55, %v2768_v55 }
 0x2d9   :  { %3134 = vmatprep.mubr.bf16.mxu0 %v2771_v16  ;;  %3174 = vmatprep.mubr.bf16.mxu1 %v2773_v27 }
 0x2da   :  { %3135 = vmatmul.mubr.bf16.vlgmr.msra.gmra.mrb[12].mxu0 %v2770_v19  ;;  %3175 = vmatmul.mubr.bf16.vlgmr.msra.gmra.mrb[20].mxu1 %v2772_v59 }
 0x2db   :  { %3712 = vmatpush3.bf16.msra.mxu0 %v4197_v58  ;;  %3727 = vmatprep.mubr.msk.bf16.mxu0 %vm4379_vm1, %v4378_v0 }
 0x2dc   :  { %3713 = vmatprep.subr.bf16.mxu0 %v4378_v0 }
 0x2df   :  { %3714 = vmatpush3.bf16.msra.mxu0 %v4198_v15 }
 0x2e0   :  { %3715 = vmatprep.subr.bf16.mxu0 %v4378_v0 }
 0x2e3   :  { %3716 = vmatpush3.bf16.msra.mxu0 %v4199_v60 }
 0x2e4   :  { %3717 = vmatprep.subr.bf16.mxu0 %v4378_v0 }
 0x2e7   :  { %3718 = vmatpush3.bf16.msra.mxu0 %v4200_v38 }
 0x2e8   :  { %3719 = vmatprep.subr.bf16.mxu0 %v4378_v0 }
 0x2eb   :  { %3720 = vmatpush3.bf16.msra.mxu0 %v4201_v63 }
 0x2ec   :  { %3721 = vmatprep.subr.bf16.mxu0 %v4378_v0 }
 0x2ef   :  { %3722 = vmatpush3.bf16.msra.mxu0 %v4202_v62 }
 0x2f0   :  { %3723 = vmatprep.subr.bf16.mxu0 %v4378_v0 }
 0x2f1   :  { %v3574_v3 = vpop.f32.mrb[4].mxu0 }
 0x2f2   :  { %v3596_v5 = vpop.f32.mrb[12].mxu1  ;;  %v3575_v6 = vpop.f32.mrb[5].mxu0 }
 0x2f3   :  { %v3576_v7 = vadd.f32 %v3575_v6, %v3574_v3  ;;  %v3597_v8 = vpop.f32.mrb[13].mxu1  ;;  %v3577_v9 = vpop.f32.mrb[6].mxu0  ;;  %3724 = vmatpush3.bf16.msra.mxu0 %v4203_v2 }
 0x2f4   :  { %v3598_v11 = vadd.f32 %v3597_v8, %v3596_v5  ;;  %v3599_v12 = vpop.f32.mrb[14].mxu1  ;;  %v3578_v17 = vpop.f32.mrb[7].mxu0  ;;  %3725 = vmatprep.subr.bf16.mxu0 %v4378_v0 }
 0x2f5   :  { %v2640_v18 = vadd.f32 %v3576_v7, %v815_v4  ;;  %v3600_v1 = vpop.f32.mrb[15].mxu1 }
 0x2f7   :  { %v2680_v29 = vadd.f32 %v3598_v11, %v2640_v18  ;;  %3726 = vmatpush3.bf16.msra.mxu0 %v4204_v10 }
 0x311   :  { %v3618_v37 = vpop.f32.mrb[8].mxu0 }
 0x312   :  { %v2759_v41 = vpop.f32.mrb[16].mxu1  ;;  %v3619_v13 = vpop.f32.mrb[9].mxu0 }
 0x313   :  { %v3620_v56 = vadd.f32 %v3619_v13, %v3618_v37  ;;  %v3709_v20 = vpop.f32.mrb[17].mxu1  ;;  %v3621_v21 = vpop.f32.mrb[10].mxu0 }
 0x314   :  { %v2762_v22 = vpop.f32.mrb[18].mxu1  ;;  %v3622_v23 = vpop.f32.mrb[11].mxu0 }
 0x315   :  { %v2720_v24 = vadd.f32 %v3620_v56, %v2680_v29  ;;  %v3710_v25 = vpop.f32.mrb[19].mxu1 }
 0x317   :  { %v2760_v26 = vadd.f32 %v2759_v41, %v2720_v24 }
 0x319   :  { %v2769_v28 = vmax.f32 %v2760_v26, 0.0 }
 0x31b   :  { %v2774_v31 = vpack.c.bf16 %v2769_v28, %v2769_v28 }
 0x31d   :  { %3728 = vmatmul.mubr.bf16.vlgmr.msra.gmra.mrb[16].mxu0 %v2774_v31 }
 0x3ad   :  { %v3649_v32 = vpop.f32.mrb[12].mxu0  ;;  %v3671_v0 = vpop.f32.mrb[20].mxu1 }
 0x3ae   :  { %v3650_v35 = vpop.f32.mrb[13].mxu0  ;;  %v3672_v36 = vpop.f32.mrb[21].mxu1 }
 0x3af   :  { %v3651_v39 = vadd.f32 %v3650_v35, %v3649_v32  ;;  %v3673_v40 = vadd.f32 %v3672_v36, %v3671_v0  ;;  %v3652_v42 = vpop.f32.mrb[14].mxu0  ;;  %v3674_v43 = vpop.f32.mrb[22].mxu1 }
 0x3b0   :  { %v3653_v44 = vpop.f32.mrb[15].mxu0  ;;  %v3675_v45 = vpop.f32.mrb[23].mxu1 }
 0x3b1   :  { %v3137_v46 = vadd.f32 %v3651_v39, %v3515_v34 }
 0x3b3   :  { %v3177_v47 = vadd.f32 %v3673_v40, %v3137_v46 }
 0x3f0   :  { %v3216_v48 = vpop.f32.mrb[16].mxu0 }
 0x3f1   :  { %v3217_v33 = vadd.f32 %v3216_v48, %v3177_v47  ;;  %v3729_v49 = vpop.f32.mrb[17].mxu0 }
 0x3f2   :  { %v3219_v57 = vpop.f32.mrb[18].mxu0 }
 0x3f3   :  { %3222 = vst [vmem:[%s4637_s7] sm:$0xff] %v3217_v33  ;;  %v3730_v61 = vpop.f32.mrb[19].mxu0 }
 0x3f4   :  { %3227 = vsyncpa [#allocation3], 1 }
 0x3f5   :  { %3228 = vsyncpa [#allocation5], 1 }
 0x3f6   :  { %3229 = vsyncpa [#allocation8], 1 }
 0x3f7   :  { %3230 = vsyncpa [#allocation11], 1 }

</bundles_post_ra>
